<compile_context>
chip_gen: v7x
topology: tpu7x:2x2x1
jax: 0.10.0
libtpu: 0.0.40
codegen_flags: <defaults>
</compile_context>

<pallas_src>
import functools

import jax
import jax.numpy as jnp
from jax.experimental import pallas as pl
from jax.experimental.pallas import tpu as pltpu


# --------------------------------------------------------------------------- #
# Fused Pallas kernel: conv1 + conv2 + t_conv1 + t_conv2 for B_TILE images
# --------------------------------------------------------------------------- #
def _convreg_kernel(cols_ref, w1_ref, b1_ref, w2_ref, b2_ref,
                    wt1_ref, bt1_ref, wbd_ref, bt2_ref, out_ref,
                    p_ref, im_ref, *, r2, c2, bt):
    """All four layers on VMEM-resident data for a tile of `bt` images.

    cols_ref : (bt*4*blk, 32) bf16   conv1 im2col patches, rows ordered
                                     (img, a, b, r, c); conv1 out pixel (2r+a, 2c+b)
    w1_ref   : (32, 64)   bf16       conv1 weight, K padded 27->32
    b1_ref   : (1, 64)    f32
    w2_ref   : (576, 128) bf16       conv2 weight flattened (kh, kw, cin) x cout
    b2_ref   : (1, 128)   f32
    wt1_ref  : (128, 256) bf16       t_conv1 weight, cols ordered (u, v, cout)
    bt1_ref  : (1, 256)   f32
    wbd_ref  : (256, 128) bf16       t_conv2 compact block-diagonal weight
    bt2_ref  : (1, 128)   f32
    out_ref  : (bt, blk, 128) bf16   lane-dense output slab
    p_ref    : (4, bt, r2+1, c2+1, 64) f32  parity-decomposed conv1 out (+ halo)
    im_ref   : (bt*blk, 576) bf16    conv2 im2col slab
    """
    f32, bf16 = jnp.float32, jnp.bfloat16
    blk = r2 * c2
    rows = bt * blk

    # Zero only the 1-wide halo row/col. The interior is fully overwritten each
    # step; doing this unconditionally keeps it correct under megacore grid
    # partitioning (each core has its own scratch).
    p_ref[:, :, 0:1, :, :] = jnp.zeros((4, bt, 1, c2 + 1, 64), f32)
    p_ref[:, :, :, 0:1, :] = jnp.zeros((4, bt, r2 + 1, 1, 64), f32)

    # ---- conv1: one batched im2col GEMM + bias + ReLU (M = bt*4*blk) ------- #
    h1 = jnp.dot(cols_ref[...], w1_ref[...], preferred_element_type=f32)
    h1 = jnp.maximum(h1 + b1_ref[...], 0.0)                 # (bt*4*blk, 64)
    h1 = h1.reshape(bt, 4, blk, 64)
    # scatter into parity-major halo scratch: p[2a+b, i, 1+r, 1+c] = conv1[i,2r+a,2c+b]
    for pb in range(4):
        p_ref[pb, :, 1:1 + r2, 1:1 + c2, :] = h1[:, pb].reshape(bt, r2, c2, 64)

    # ---- conv2: gather 9 shifted taps into im2col slab, one K=576 GEMM ----- #
    # tap index kh/kw -> (parity, slice start):
    #   k==0 reads the odd-parity plane through the zero halo, k==1 even parity,
    #   k==2 odd parity unshifted.
    sel = {0: (1, 0), 1: (0, 1), 2: (1, 1)}
    for kh in range(3):
        a, rs = sel[kh]
        for kw in range(3):
            b, cs = sel[kw]
            t = p_ref[2 * a + b, :, rs:rs + r2, cs:cs + c2, :]  # (bt, r2, c2, 64)
            k = kh * 3 + kw
            im_ref[:, k * 64:(k + 1) * 64] = t.reshape(rows, 64).astype(bf16)
    h2 = jnp.dot(im_ref[...], w2_ref[...], preferred_element_type=f32)
    h2 = jnp.maximum(h2 + b2_ref[...], 0.0).astype(bf16)    # (rows, 128)

    # ---- t_conv1 (k=2, s=2, non-overlapping): per-pixel GEMM + ReLU -------- #
    h3 = jnp.maximum(
        jnp.dot(h2, wt1_ref[...], preferred_element_type=f32) + bt1_ref[...],
        0.0).astype(bf16)                                    # (rows, 256)

    # ---- t_conv2: compact block-diagonal GEMM + sigmoid, 128-lane store ---- #
    o2 = jnp.dot(h3, wbd_ref[...], preferred_element_type=f32) + bt2_ref[...]
    out_ref[...] = jax.nn.sigmoid(o2).reshape(bt, blk, 128).astype(out_ref.dtype)


# --------------------------------------------------------------------------- #
# One-time weight packing (PyTorch layouts -> kernel GEMM layouts)
# --------------------------------------------------------------------------- #
def prepare_params(p):
    bf16, f32 = jnp.bfloat16, jnp.float32

    # conv1: OIHW (64,3,3,3) -> (kh,kw,cin,cout) -> (27,64), pad K to 32
    w1 = jnp.transpose(p["w1"], (2, 3, 1, 0)).reshape(27, 64)
    w1 = jnp.pad(w1, ((0, 5), (0, 0))).astype(bf16)
    b1 = p["b1"].reshape(1, 64).astype(f32)

    # conv2: OIHW (128,64,3,3) -> (kh,kw,cin,cout) -> (576,128) for one K=576 GEMM
    w2 = jnp.transpose(p["w2"], (2, 3, 1, 0)).reshape(576, 128).astype(bf16)
    b2 = p["b2"].reshape(1, 128).astype(f32)

    # t_conv1: IOHW (128,64,2,2) -> (cin,u,v,cout) -> (128, 256)
    wt1 = jnp.transpose(p["wt1"], (0, 2, 3, 1)).reshape(128, 256).astype(bf16)
    bt1 = jnp.tile(p["bt1"], 4).reshape(1, 256).astype(f32)

    # t_conv2: IOHW (64,3,2,2) -> (cin,u2,v2,cout) -> (64,12), pad to a 32-lane
    # stripe, then block-diagonal over the 4 (u,v) positions -> compact (256,128).
    wt2 = jnp.transpose(p["wt2"], (0, 2, 3, 1)).reshape(64, 12)
    wt2 = jnp.pad(wt2, ((0, 0), (0, 20)))                           # (64, 32)
    wbd = jnp.kron(jnp.eye(4, dtype=wt2.dtype), wt2).astype(bf16)   # (256, 128)
    bt2_stripe = jnp.pad(jnp.tile(p["bt2"], 4), (0, 20))            # (32,)
    bt2 = jnp.tile(bt2_stripe, 4).reshape(1, 128).astype(f32)

    return {"w1": w1, "b1": b1, "w2": w2, "b2": b2,
            "wt1": wt1, "bt1": bt1, "wbd": wbd, "bt2": bt2}


# --------------------------------------------------------------------------- #
# Wrapper glue (input-side im2col + output-side pixel shuffle; tiny tensors)
# --------------------------------------------------------------------------- #
def _conv1_patches(x_nhwc):
    """im2col for Conv2d(3,64,3,s=2,p=1); rows ordered by output parity (a,b,r,c)."""
    N, H, W, C = x_nhwc.shape
    Ho, Wo = H // 2, W // 2
    xp = jnp.pad(x_nhwc, ((0, 0), (1, 1), (1, 1), (0, 0)))
    taps = [xp[:, kh:kh + 2 * Ho:2, kw:kw + 2 * Wo:2, :]
            for kh in range(3) for kw in range(3)]
    pat = jnp.stack(taps, axis=3).reshape(N, Ho, Wo, 9 * C)   # cols (kh,kw,cin)
    # reorder rows (oh, ow) -> (a, b, r, c) with oh = 2r+a, ow = 2c+b
    pat = pat.reshape(N, Ho // 2, 2, Wo // 2, 2, 9 * C)
    pat = jnp.transpose(pat, (0, 2, 4, 1, 3, 5)).reshape(N, Ho * Wo, 9 * C)
    pat = jnp.pad(pat, ((0, 0), (0, 0), (0, 32 - 9 * C)))     # K: 27 -> 32
    return pat.astype(jnp.bfloat16)


def _pick_btile(N, r2, c2):
    """Images per grid step: fill the MXU M dim, keep >=2 steps, respect VMEM."""
    blk = r2 * c2
    rup = lambda x, m: ((x + m - 1) // m) * m
    per_img = (2 * 4 * blk * 32 * 2                          # cols bf16 (dbl-buf)
               + 2 * blk * 128 * 2                           # out slab bf16 (dbl-buf)
               + 4 * (r2 + 1) * rup(c2 + 1, 8) * 128 * 4     # parity scratch (padded tiles)
               + rup(blk, 16) * rup(576, 128) * 2)           # conv2 im2col scratch
    cap = max(1, min(128, (20 << 20) // per_img))            # ~20 MiB activation budget
    return max(1, min(cap, -(-N // 2)))                      # >=2 steps when N>=2 (v7x 2 TCs)


def convreg_forward(x_nchw, prep):
    N, C, H, W = x_nchw.shape
    assert C == 3 and H % 4 == 0 and W % 4 == 0, (C, H, W)
    r2, c2 = H // 4, W // 4                   # conv2 output spatial size
    blk = r2 * c2
    bt = _pick_btile(N, r2, c2)
    Np = -(-N // bt) * bt                     # pad batch to a multiple of bt

    x = jnp.transpose(x_nchw, (0, 2, 3, 1))   # NCHW -> NHWC
    cols = _conv1_patches(x)                  # (N, 4*blk, 32) bf16
    if Np != N:
        cols = jnp.pad(cols, ((0, Np - N), (0, 0), (0, 0)))
    cols = cols.reshape(Np * 4 * blk, 32)     # flat 2-D slab (no in-kernel merge)

    flops = 2 * Np * blk * (4 * 32 * 64 + 576 * 128 + 128 * 256 + 256 * 128)
    bytes_accessed = (cols.size * 2 + Np * blk * 128 * 2
                      + sum(int(v.size) * v.dtype.itemsize for v in prep.values()))

    slab = pl.pallas_call(
        functools.partial(_convreg_kernel, r2=r2, c2=c2, bt=bt),
        out_shape=jax.ShapeDtypeStruct((Np, blk, 128), jnp.bfloat16),
        grid=(Np // bt,),
        in_specs=[
            pl.BlockSpec((bt * 4 * blk, 32), lambda n: (n, 0)),
            pl.BlockSpec((32, 64), lambda n: (0, 0)),
            pl.BlockSpec((1, 64), lambda n: (0, 0)),
            pl.BlockSpec((576, 128), lambda n: (0, 0)),
            pl.BlockSpec((1, 128), lambda n: (0, 0)),
            pl.BlockSpec((128, 256), lambda n: (0, 0)),
            pl.BlockSpec((1, 256), lambda n: (0, 0)),
            pl.BlockSpec((256, 128), lambda n: (0, 0)),
            pl.BlockSpec((1, 128), lambda n: (0, 0)),
        ],
        out_specs=pl.BlockSpec((bt, blk, 128), lambda n: (n, 0, 0)),
        scratch_shapes=[
            pltpu.VMEM((4, bt, r2 + 1, c2 + 1, 64), jnp.float32),
            pltpu.VMEM((bt * blk, 576), jnp.bfloat16),
        ],
        compiler_params=pltpu.CompilerParams(
            dimension_semantics=("parallel",),
            vmem_limit_bytes=32 * 1024 * 1024),
        cost_estimate=pl.CostEstimate(
            flops=flops, transcendentals=Np * blk * 128,
            bytes_accessed=bytes_accessed),
    )(cols, prep["w1"], prep["b1"], prep["w2"], prep["b2"],
      prep["wt1"], prep["bt1"], prep["wbd"], prep["bt2"])

    # pixel-shuffle the lane-dense slab back to NCHW (layout plumbing only)
    y = slab[:N].reshape(N, r2, c2, 4, 32)[..., :12]
    y = y.reshape(N, r2, c2, 2, 2, 2, 2, 3)          # (N, r, c, u, v, u2, v2, co)
    y = jnp.transpose(y, (0, 7, 1, 3, 5, 2, 4, 6))   # (N, co, r, u, u2, c, v, v2)
    return y.reshape(N, 3, H, W).astype(jnp.float32)


# --------------------------------------------------------------------------- #
# Deterministic parameter init (PyTorch weight shapes; synthetic values)
# --------------------------------------------------------------------------- #
def init_params(key):
    ks = jax.random.split(key, 8)

    def u(k, shape, fan_in):
        bound = 1.0 / jnp.sqrt(jnp.float32(fan_in))
        return jax.random.uniform(k, shape, jnp.float32, -bound, bound)

    return {
        "w1": u(ks[0], (64, 3, 3, 3), 3 * 9),        # Conv2d(3, 64, 3)   OIHW
        "b1": u(ks[1], (64,), 3 * 9),
        "w2": u(ks[2], (128, 64, 3, 3), 64 * 9),     # Conv2d(64, 128, 3) OIHW
        "b2": u(ks[3], (128,), 64 * 9),
        "wt1": u(ks[4], (128, 64, 2, 2), 128 * 4),   # ConvT(128, 64, 2)  IOHW
        "bt1": u(ks[5], (64,), 128 * 4),
        "wt2": u(ks[6], (64, 3, 2, 2), 64 * 4),      # ConvT(64, 3, 2)    IOHW
        "bt2": u(ks[7], (3,), 64 * 4),
    }


# --------------------------------------------------------------------------- #
# Pure-JAX reference (XLA convs, f32) for correctness checking
# --------------------------------------------------------------------------- #
def ref_forward(x, p):
    def conv(x, w, b, stride, pad):
        dn = jax.lax.conv_dimension_numbers(x.shape, w.shape, ("NCHW", "OIHW", "NCHW"))
        y = jax.lax.conv_general_dilated(
            x, w, (stride, stride), ((pad, pad), (pad, pad)), dimension_numbers=dn
        )
        return y + b[None, :, None, None]

    def tconv(x, w_io, b):  # k=2, s=2, p=0 transposed conv via lhs dilation
        w = jnp.flip(jnp.transpose(w_io, (1, 0, 2, 3)), axis=(2, 3))  # OIHW, flipped
        dn = jax.lax.conv_dimension_numbers(x.shape, w.shape, ("NCHW", "OIHW", "NCHW"))
        y = jax.lax.conv_general_dilated(
            x, w, (1, 1), ((1, 1), (1, 1)), lhs_dilation=(2, 2), dimension_numbers=dn
        )
        return y + b[None, :, None, None]

    y = jnp.maximum(conv(x, p["w1"], p["b1"], 2, 1), 0.0)
    y = jnp.maximum(conv(y, p["w2"], p["b2"], 2, 1), 0.0)
    y = jnp.maximum(tconv(y, p["wt1"], p["bt1"]), 0.0)
    return jax.nn.sigmoid(tconv(y, p["wt2"], p["bt2"]))


if __name__ == "__main__":
    key = jax.random.PRNGKey(0)
    kx, kp = jax.random.split(key)
    # small batch that still exercises batched grid steps (B_TILE=4, grid=2)
    x = jax.random.normal(kx, (8, 3, 16, 16), dtype=jnp.float32)  # NCHW like PyTorch
    params = init_params(kp)
    prep = prepare_params(params)     # hoisted one-time weight packing

    fwd = jax.jit(convreg_forward)
    out = jax.block_until_ready(fwd(x, prep))
    assert out.shape == (8, 3, 16, 16), out.shape

    ref = jax.block_until_ready(ref_forward(x, params))
    # bf16 MXU operands + bf16 output slab (f32 accumulation) -> loose tolerance
    assert jnp.allclose(out, ref, atol=3e-2, rtol=3e-2), float(
        jnp.max(jnp.abs(out - ref))
    )

    print("KERNEL_OK")
</pallas_src>

<mosaic_0001>
module attributes {stable_mosaic.version = 11 : i64} {
  func.func @_convreg_kernel(%arg0: i32, %arg1: memref<256x32xbf16, #tpu.memory_space<vmem>>, %arg2: memref<32x64xbf16, #tpu.memory_space<vmem>>, %arg3: memref<1x64xf32, #tpu.memory_space<vmem>>, %arg4: memref<576x128xbf16, #tpu.memory_space<vmem>>, %arg5: memref<1x128xf32, #tpu.memory_space<vmem>>, %arg6: memref<128x256xbf16, #tpu.memory_space<vmem>>, %arg7: memref<1x256xf32, #tpu.memory_space<vmem>>, %arg8: memref<256x128xbf16, #tpu.memory_space<vmem>>, %arg9: memref<1x128xf32, #tpu.memory_space<vmem>>, %arg10: memref<4x16x128xbf16, #tpu.memory_space<vmem>>, %arg11: memref<4x4x5x5x64xf32, #tpu.memory_space<vmem>>, %arg12: memref<64x576xbf16, #tpu.memory_space<vmem>>) attributes {dimension_semantics = [#tpu.dimension_semantics<parallel>], iteration_bounds = array<i64: 2>, scalar_prefetch = 0 : i64, scratch_operands = 2 : i64, tpu.core_type = #tpu.core_type<tc>, window_params = [{transform_indices = @transform_0, window_bounds = array<i64: 256, 32>}, {pipeline_mode = #tpu.pipeline_mode<synchronous>, transform_indices = @transform_1, window_bounds = array<i64: 32, 64>}, {pipeline_mode = #tpu.pipeline_mode<synchronous>, transform_indices = @transform_2, window_bounds = array<i64: 1, 64>}, {pipeline_mode = #tpu.pipeline_mode<synchronous>, transform_indices = @transform_3, window_bounds = array<i64: 576, 128>}, {pipeline_mode = #tpu.pipeline_mode<synchronous>, transform_indices = @transform_4, window_bounds = array<i64: 1, 128>}, {pipeline_mode = #tpu.pipeline_mode<synchronous>, transform_indices = @transform_5, window_bounds = array<i64: 128, 256>}, {pipeline_mode = #tpu.pipeline_mode<synchronous>, transform_indices = @transform_6, window_bounds = array<i64: 1, 256>}, {pipeline_mode = #tpu.pipeline_mode<synchronous>, transform_indices = @transform_7, window_bounds = array<i64: 256, 128>}, {pipeline_mode = #tpu.pipeline_mode<synchronous>, transform_indices = @transform_8, window_bounds = array<i64: 1, 128>}, {transform_indices = @transform_9, window_bounds = array<i64: 4, 16, 128>}]} {
    %cst = arith.constant 0.000000e+00 : f32
    %0 = vector.broadcast %cst : f32 to vector<4x4x1x5x64xf32>
    %c0 = arith.constant 0 : index
    %c0_0 = arith.constant 0 : index
    %c0_1 = arith.constant 0 : index
    %c0_2 = arith.constant 0 : index
    %c0_3 = arith.constant 0 : index
    %1 = vector.load %arg11[%c0, %c0_0, %c0_1, %c0_2, %c0_3] : memref<4x4x5x5x64xf32, #tpu.memory_space<vmem>>, vector<4x4x1x5x64xf32>
    tpu.vector_store %arg11[%c0, %c0_0, %c0_1, %c0_2, %c0_3], %0 {strides = array<i32>} : memref<4x4x5x5x64xf32, #tpu.memory_space<vmem>>, vector<4x4x1x5x64xf32>,
    %cst_4 = arith.constant 0.000000e+00 : f32
    %2 = vector.broadcast %cst_4 : f32 to vector<4x4x5x1x64xf32>
    %c0_5 = arith.constant 0 : index
    %c0_6 = arith.constant 0 : index
    %c0_7 = arith.constant 0 : index
    %c0_8 = arith.constant 0 : index
    %c0_9 = arith.constant 0 : index
    %3 = vector.load %arg11[%c0_5, %c0_6, %c0_7, %c0_8, %c0_9] : memref<4x4x5x5x64xf32, #tpu.memory_space<vmem>>, vector<4x4x5x1x64xf32>
    tpu.vector_store %arg11[%c0_5, %c0_6, %c0_7, %c0_8, %c0_9], %2 {strides = array<i32>} : memref<4x4x5x5x64xf32, #tpu.memory_space<vmem>>, vector<4x4x5x1x64xf32>,
    %c0_10 = arith.constant 0 : index
    %c0_11 = arith.constant 0 : index
    %4 = vector.load %arg1[%c0_10, %c0_11] : memref<256x32xbf16, #tpu.memory_space<vmem>>, vector<256x32xbf16>
    %c0_12 = arith.constant 0 : index
    %c0_13 = arith.constant 0 : index
    %5 = vector.load %arg2[%c0_12, %c0_13] : memref<32x64xbf16, #tpu.memory_space<vmem>>, vector<32x64xbf16>
    %cst_14 = arith.constant dense<0.000000e+00> : vector<256x64xf32>
    %6 = tpu.matmul %4, %5, %cst_14 {dimension_numbers = #tpu.dot_dimension_numbers<[1], [0], [0], [1], [0, 0, 1, 1], [], []>} : vector<256x32xbf16>, vector<32x64xbf16>, vector<256x64xf32> -> vector<256x64xf32>
    %c0_15 = arith.constant 0 : index
    %c0_16 = arith.constant 0 : index
    %7 = vector.load %arg3[%c0_15, %c0_16] : memref<1x64xf32, #tpu.memory_space<vmem>>, vector<1x64xf32>
    %8 = vector.broadcast %7 : vector<1x64xf32> to vector<256x64xf32>
    %9 = arith.addf %6, %8 : vector<256x64xf32>
    %cst_17 = arith.constant 0.000000e+00 : f32
    %10 = vector.broadcast %cst_17 : f32 to vector<256x64xf32>
    %11 = arith.maximumf %9, %10 : vector<256x64xf32>
    %12 = vector.shape_cast %11 : vector<256x64xf32> to vector<4x4x16x64xf32>
    %13 = vector.extract_strided_slice %12 {offsets = [0, 0, 0, 0], sizes = [4, 1, 16, 64], strides = [1, 1, 1, 1]} : vector<4x4x16x64xf32> to vector<4x1x16x64xf32>
    %14 = vector.shape_cast %13 : vector<4x1x16x64xf32> to vector<4x16x64xf32>
    %15 = vector.shape_cast %14 : vector<4x16x64xf32> to vector<4x4x4x64xf32>
    %c0_18 = arith.constant 0 : index
    %c0_19 = arith.constant 0 : index
    %c1 = arith.constant 1 : index
    %c1_20 = arith.constant 1 : index
    %c0_21 = arith.constant 0 : index
    %16 = vector.load %arg11[%c0_18, %c0_19, %c1, %c1_20, %c0_21] : memref<4x4x5x5x64xf32, #tpu.memory_space<vmem>>, vector<1x4x4x4x64xf32>
    %17 = vector.shape_cast %16 : vector<1x4x4x4x64xf32> to vector<4x4x4x64xf32>
    %18 = vector.shape_cast %15 : vector<4x4x4x64xf32> to vector<1x4x4x4x64xf32>
    tpu.vector_store %arg11[%c0_18, %c0_19, %c1, %c1_20, %c0_21], %18 {strides = array<i32>} : memref<4x4x5x5x64xf32, #tpu.memory_space<vmem>>, vector<1x4x4x4x64xf32>,
    %19 = vector.extract_strided_slice %12 {offsets = [0, 1, 0, 0], sizes = [4, 1, 16, 64], strides = [1, 1, 1, 1]} : vector<4x4x16x64xf32> to vector<4x1x16x64xf32>
    %20 = vector.shape_cast %19 : vector<4x1x16x64xf32> to vector<4x16x64xf32>
    %21 = vector.shape_cast %20 : vector<4x16x64xf32> to vector<4x4x4x64xf32>
    %c1_22 = arith.constant 1 : index
    %c0_23 = arith.constant 0 : index
    %c1_24 = arith.constant 1 : index
    %c1_25 = arith.constant 1 : index
    %c0_26 = arith.constant 0 : index
    %22 = vector.load %arg11[%c1_22, %c0_23, %c1_24, %c1_25, %c0_26] : memref<4x4x5x5x64xf32, #tpu.memory_space<vmem>>, vector<1x4x4x4x64xf32>
    %23 = vector.shape_cast %22 : vector<1x4x4x4x64xf32> to vector<4x4x4x64xf32>
    %24 = vector.shape_cast %21 : vector<4x4x4x64xf32> to vector<1x4x4x4x64xf32>
    tpu.vector_store %arg11[%c1_22, %c0_23, %c1_24, %c1_25, %c0_26], %24 {strides = array<i32>} : memref<4x4x5x5x64xf32, #tpu.memory_space<vmem>>, vector<1x4x4x4x64xf32>,
    %25 = vector.extract_strided_slice %12 {offsets = [0, 2, 0, 0], sizes = [4, 1, 16, 64], strides = [1, 1, 1, 1]} : vector<4x4x16x64xf32> to vector<4x1x16x64xf32>
    %26 = vector.shape_cast %25 : vector<4x1x16x64xf32> to vector<4x16x64xf32>
    %27 = vector.shape_cast %26 : vector<4x16x64xf32> to vector<4x4x4x64xf32>
    %c2 = arith.constant 2 : index
    %c0_27 = arith.constant 0 : index
    %c1_28 = arith.constant 1 : index
    %c1_29 = arith.constant 1 : index
    %c0_30 = arith.constant 0 : index
    %28 = vector.load %arg11[%c2, %c0_27, %c1_28, %c1_29, %c0_30] : memref<4x4x5x5x64xf32, #tpu.memory_space<vmem>>, vector<1x4x4x4x64xf32>
    %29 = vector.shape_cast %28 : vector<1x4x4x4x64xf32> to vector<4x4x4x64xf32>
    %30 = vector.shape_cast %27 : vector<4x4x4x64xf32> to vector<1x4x4x4x64xf32>
    tpu.vector_store %arg11[%c2, %c0_27, %c1_28, %c1_29, %c0_30], %30 {strides = array<i32>} : memref<4x4x5x5x64xf32, #tpu.memory_space<vmem>>, vector<1x4x4x4x64xf32>,
    %31 = vector.extract_strided_slice %12 {offsets = [0, 3, 0, 0], sizes = [4, 1, 16, 64], strides = [1, 1, 1, 1]} : vector<4x4x16x64xf32> to vector<4x1x16x64xf32>
    %32 = vector.shape_cast %31 : vector<4x1x16x64xf32> to vector<4x16x64xf32>
    %33 = vector.shape_cast %32 : vector<4x16x64xf32> to vector<4x4x4x64xf32>
    %c3 = arith.constant 3 : index
    %c0_31 = arith.constant 0 : index
    %c1_32 = arith.constant 1 : index
    %c1_33 = arith.constant 1 : index
    %c0_34 = arith.constant 0 : index
    %34 = vector.load %arg11[%c3, %c0_31, %c1_32, %c1_33, %c0_34] : memref<4x4x5x5x64xf32, #tpu.memory_space<vmem>>, vector<1x4x4x4x64xf32>
    %35 = vector.shape_cast %34 : vector<1x4x4x4x64xf32> to vector<4x4x4x64xf32>
    %36 = vector.shape_cast %33 : vector<4x4x4x64xf32> to vector<1x4x4x4x64xf32>
    tpu.vector_store %arg11[%c3, %c0_31, %c1_32, %c1_33, %c0_34], %36 {strides = array<i32>} : memref<4x4x5x5x64xf32, #tpu.memory_space<vmem>>, vector<1x4x4x4x64xf32>,
    %c3_35 = arith.constant 3 : index
    %c0_36 = arith.constant 0 : index
    %c0_37 = arith.constant 0 : index
    %c0_38 = arith.constant 0 : index
    %c0_39 = arith.constant 0 : index
    %37 = vector.load %arg11[%c3_35, %c0_36, %c0_37, %c0_38, %c0_39] : memref<4x4x5x5x64xf32, #tpu.memory_space<vmem>>, vector<1x4x4x4x64xf32>
    %38 = vector.shape_cast %37 : vector<1x4x4x4x64xf32> to vector<4x4x4x64xf32>
    %39 = vector.shape_cast %38 : vector<4x4x4x64xf32> to vector<64x64xf32>
    %40 = arith.truncf %39 : vector<64x64xf32> to vector<64x64xbf16>
    %c0_40 = arith.constant 0 : index
    %c0_41 = arith.constant 0 : index
    %41 = vector.load %arg12[%c0_40, %c0_41] : memref<64x576xbf16, #tpu.memory_space<vmem>>, vector<64x64xbf16>
    tpu.vector_store %arg12[%c0_40, %c0_41], %40 {strides = array<i32>} : memref<64x576xbf16, #tpu.memory_space<vmem>>, vector<64x64xbf16>,
    %c2_42 = arith.constant 2 : index
    %c0_43 = arith.constant 0 : index
    %c0_44 = arith.constant 0 : index
    %c1_45 = arith.constant 1 : index
    %c0_46 = arith.constant 0 : index
    %42 = vector.load %arg11[%c2_42, %c0_43, %c0_44, %c1_45, %c0_46] : memref<4x4x5x5x64xf32, #tpu.memory_space<vmem>>, vector<1x4x4x4x64xf32>
    %43 = vector.shape_cast %42 : vector<1x4x4x4x64xf32> to vector<4x4x4x64xf32>
    %44 = vector.shape_cast %43 : vector<4x4x4x64xf32> to vector<64x64xf32>
    %45 = arith.truncf %44 : vector<64x64xf32> to vector<64x64xbf16>
    %c0_47 = arith.constant 0 : index
    %c64 = arith.constant 64 : index
    %46 = vector.load %arg12[%c0_47, %c64] : memref<64x576xbf16, #tpu.memory_space<vmem>>, vector<64x64xbf16>
    tpu.vector_store %arg12[%c0_47, %c64], %45 {strides = array<i32>} : memref<64x576xbf16, #tpu.memory_space<vmem>>, vector<64x64xbf16>,
    %c3_48 = arith.constant 3 : index
    %c0_49 = arith.constant 0 : index
    %c0_50 = arith.constant 0 : index
    %c1_51 = arith.constant 1 : index
    %c0_52 = arith.constant 0 : index
    %47 = vector.load %arg11[%c3_48, %c0_49, %c0_50, %c1_51, %c0_52] : memref<4x4x5x5x64xf32, #tpu.memory_space<vmem>>, vector<1x4x4x4x64xf32>
    %48 = vector.shape_cast %47 : vector<1x4x4x4x64xf32> to vector<4x4x4x64xf32>
    %49 = vector.shape_cast %48 : vector<4x4x4x64xf32> to vector<64x64xf32>
    %50 = arith.truncf %49 : vector<64x64xf32> to vector<64x64xbf16>
    %c0_53 = arith.constant 0 : index
    %c128 = arith.constant 128 : index
    %51 = vector.load %arg12[%c0_53, %c128] : memref<64x576xbf16, #tpu.memory_space<vmem>>, vector<64x64xbf16>
    tpu.vector_store %arg12[%c0_53, %c128], %50 {strides = array<i32>} : memref<64x576xbf16, #tpu.memory_space<vmem>>, vector<64x64xbf16>,
    %c1_54 = arith.constant 1 : index
    %c0_55 = arith.constant 0 : index
    %c1_56 = arith.constant 1 : index
    %c0_57 = arith.constant 0 : index
    %c0_58 = arith.constant 0 : index
    %52 = vector.load %arg11[%c1_54, %c0_55, %c1_56, %c0_57, %c0_58] : memref<4x4x5x5x64xf32, #tpu.memory_space<vmem>>, vector<1x4x4x4x64xf32>
    %53 = vector.shape_cast %52 : vector<1x4x4x4x64xf32> to vector<4x4x4x64xf32>
    %54 = vector.shape_cast %53 : vector<4x4x4x64xf32> to vector<64x64xf32>
    %55 = arith.truncf %54 : vector<64x64xf32> to vector<64x64xbf16>
    %c0_59 = arith.constant 0 : index
    %c192 = arith.constant 192 : index
    %56 = vector.load %arg12[%c0_59, %c192] : memref<64x576xbf16, #tpu.memory_space<vmem>>, vector<64x64xbf16>
    tpu.vector_store %arg12[%c0_59, %c192], %55 {strides = array<i32>} : memref<64x576xbf16, #tpu.memory_space<vmem>>, vector<64x64xbf16>,
    %c0_60 = arith.constant 0 : index
    %c0_61 = arith.constant 0 : index
    %c1_62 = arith.constant 1 : index
    %c1_63 = arith.constant 1 : index
    %c0_64 = arith.constant 0 : index
    %57 = vector.load %arg11[%c0_60, %c0_61, %c1_62, %c1_63, %c0_64] : memref<4x4x5x5x64xf32, #tpu.memory_space<vmem>>, vector<1x4x4x4x64xf32>
    %58 = vector.shape_cast %57 : vector<1x4x4x4x64xf32> to vector<4x4x4x64xf32>
    %59 = vector.shape_cast %58 : vector<4x4x4x64xf32> to vector<64x64xf32>
    %60 = arith.truncf %59 : vector<64x64xf32> to vector<64x64xbf16>
    %c0_65 = arith.constant 0 : index
    %c256 = arith.constant 256 : index
    %61 = vector.load %arg12[%c0_65, %c256] : memref<64x576xbf16, #tpu.memory_space<vmem>>, vector<64x64xbf16>
    tpu.vector_store %arg12[%c0_65, %c256], %60 {strides = array<i32>} : memref<64x576xbf16, #tpu.memory_space<vmem>>, vector<64x64xbf16>,
    %c1_66 = arith.constant 1 : index
    %c0_67 = arith.constant 0 : index
    %c1_68 = arith.constant 1 : index
    %c1_69 = arith.constant 1 : index
    %c0_70 = arith.constant 0 : index
    %62 = vector.load %arg11[%c1_66, %c0_67, %c1_68, %c1_69, %c0_70] : memref<4x4x5x5x64xf32, #tpu.memory_space<vmem>>, vector<1x4x4x4x64xf32>
    %63 = vector.shape_cast %62 : vector<1x4x4x4x64xf32> to vector<4x4x4x64xf32>
    %64 = vector.shape_cast %63 : vector<4x4x4x64xf32> to vector<64x64xf32>
    %65 = arith.truncf %64 : vector<64x64xf32> to vector<64x64xbf16>
    %c0_71 = arith.constant 0 : index
    %c320 = arith.constant 320 : index
    %66 = vector.load %arg12[%c0_71, %c320] : memref<64x576xbf16, #tpu.memory_space<vmem>>, vector<64x64xbf16>
    tpu.vector_store %arg12[%c0_71, %c320], %65 {strides = array<i32>} : memref<64x576xbf16, #tpu.memory_space<vmem>>, vector<64x64xbf16>,
    %c3_72 = arith.constant 3 : index
    %c0_73 = arith.constant 0 : index
    %c1_74 = arith.constant 1 : index
    %c0_75 = arith.constant 0 : index
    %c0_76 = arith.constant 0 : index
    %67 = vector.load %arg11[%c3_72, %c0_73, %c1_74, %c0_75, %c0_76] : memref<4x4x5x5x64xf32, #tpu.memory_space<vmem>>, vector<1x4x4x4x64xf32>
    %68 = vector.shape_cast %67 : vector<1x4x4x4x64xf32> to vector<4x4x4x64xf32>
    %69 = vector.shape_cast %68 : vector<4x4x4x64xf32> to vector<64x64xf32>
    %70 = arith.truncf %69 : vector<64x64xf32> to vector<64x64xbf16>
    %c0_77 = arith.constant 0 : index
    %c384 = arith.constant 384 : index
    %71 = vector.load %arg12[%c0_77, %c384] : memref<64x576xbf16, #tpu.memory_space<vmem>>, vector<64x64xbf16>
    tpu.vector_store %arg12[%c0_77, %c384], %70 {strides = array<i32>} : memref<64x576xbf16, #tpu.memory_space<vmem>>, vector<64x64xbf16>,
    %c2_78 = arith.constant 2 : index
    %c0_79 = arith.constant 0 : index
    %c1_80 = arith.constant 1 : index
    %c1_81 = arith.constant 1 : index
    %c0_82 = arith.constant 0 : index
    %72 = vector.load %arg11[%c2_78, %c0_79, %c1_80, %c1_81, %c0_82] : memref<4x4x5x5x64xf32, #tpu.memory_space<vmem>>, vector<1x4x4x4x64xf32>
    %73 = vector.shape_cast %72 : vector<1x4x4x4x64xf32> to vector<4x4x4x64xf32>
    %74 = vector.shape_cast %73 : vector<4x4x4x64xf32> to vector<64x64xf32>
    %75 = arith.truncf %74 : vector<64x64xf32> to vector<64x64xbf16>
    %c0_83 = arith.constant 0 : index
    %c448 = arith.constant 448 : index
    %76 = vector.load %arg12[%c0_83, %c448] : memref<64x576xbf16, #tpu.memory_space<vmem>>, vector<64x64xbf16>
    tpu.vector_store %arg12[%c0_83, %c448], %75 {strides = array<i32>} : memref<64x576xbf16, #tpu.memory_space<vmem>>, vector<64x64xbf16>,
    %c3_84 = arith.constant 3 : index
    %c0_85 = arith.constant 0 : index
    %c1_86 = arith.constant 1 : index
    %c1_87 = arith.constant 1 : index
    %c0_88 = arith.constant 0 : index
    %77 = vector.load %arg11[%c3_84, %c0_85, %c1_86, %c1_87, %c0_88] : memref<4x4x5x5x64xf32, #tpu.memory_space<vmem>>, vector<1x4x4x4x64xf32>
    %78 = vector.shape_cast %77 : vector<1x4x4x4x64xf32> to vector<4x4x4x64xf32>
    %79 = vector.shape_cast %78 : vector<4x4x4x64xf32> to vector<64x64xf32>
    %80 = arith.truncf %79 : vector<64x64xf32> to vector<64x64xbf16>
    %c0_89 = arith.constant 0 : index
    %c512 = arith.constant 512 : index
    %81 = vector.load %arg12[%c0_89, %c512] : memref<64x576xbf16, #tpu.memory_space<vmem>>, vector<64x64xbf16>
    tpu.vector_store %arg12[%c0_89, %c512], %80 {strides = array<i32>} : memref<64x576xbf16, #tpu.memory_space<vmem>>, vector<64x64xbf16>,
    %c0_90 = arith.constant 0 : index
    %c0_91 = arith.constant 0 : index
    %82 = vector.load %arg12[%c0_90, %c0_91] : memref<64x576xbf16, #tpu.memory_space<vmem>>, vector<64x576xbf16>
    %c0_92 = arith.constant 0 : index
    %c0_93 = arith.constant 0 : index
    %83 = vector.load %arg4[%c0_92, %c0_93] : memref<576x128xbf16, #tpu.memory_space<vmem>>, vector<576x128xbf16>
    %cst_94 = arith.constant dense<0.000000e+00> : vector<64x128xf32>
    %84 = tpu.matmul %82, %83, %cst_94 {dimension_numbers = #tpu.dot_dimension_numbers<[1], [0], [0], [1], [0, 0, 1, 1], [], []>} : vector<64x576xbf16>, vector<576x128xbf16>, vector<64x128xf32> -> vector<64x128xf32>
    %c0_95 = arith.constant 0 : index
    %c0_96 = arith.constant 0 : index
    %85 = vector.load %arg5[%c0_95, %c0_96] : memref<1x128xf32, #tpu.memory_space<vmem>>, vector<1x128xf32>
    %86 = vector.broadcast %85 : vector<1x128xf32> to vector<64x128xf32>
    %87 = arith.addf %84, %86 : vector<64x128xf32>
    %cst_97 = arith.constant 0.000000e+00 : f32
    %88 = vector.broadcast %cst_97 : f32 to vector<64x128xf32>
    %89 = arith.maximumf %87, %88 : vector<64x128xf32>
    %90 = arith.truncf %89 : vector<64x128xf32> to vector<64x128xbf16>
    %c0_98 = arith.constant 0 : index
    %c0_99 = arith.constant 0 : index
    %91 = vector.load %arg6[%c0_98, %c0_99] : memref<128x256xbf16, #tpu.memory_space<vmem>>, vector<128x256xbf16>
    %cst_100 = arith.constant dense<0.000000e+00> : vector<64x256xf32>
    %92 = tpu.matmul %90, %91, %cst_100 {dimension_numbers = #tpu.dot_dimension_numbers<[1], [0], [0], [1], [0, 0, 1, 1], [], []>} : vector<64x128xbf16>, vector<128x256xbf16>, vector<64x256xf32> -> vector<64x256xf32>
    %c0_101 = arith.constant 0 : index
    %c0_102 = arith.constant 0 : index
    %93 = vector.load %arg7[%c0_101, %c0_102] : memref<1x256xf32, #tpu.memory_space<vmem>>, vector<1x256xf32>
    %94 = vector.broadcast %93 : vector<1x256xf32> to vector<64x256xf32>
    %95 = arith.addf %92, %94 : vector<64x256xf32>
    %cst_103 = arith.constant 0.000000e+00 : f32
    %96 = vector.broadcast %cst_103 : f32 to vector<64x256xf32>
    %97 = arith.maximumf %95, %96 : vector<64x256xf32>
    %98 = arith.truncf %97 : vector<64x256xf32> to vector<64x256xbf16>
    %c0_104 = arith.constant 0 : index
    %c0_105 = arith.constant 0 : index
    %99 = vector.load %arg8[%c0_104, %c0_105] : memref<256x128xbf16, #tpu.memory_space<vmem>>, vector<256x128xbf16>
    %cst_106 = arith.constant dense<0.000000e+00> : vector<64x128xf32>
    %100 = tpu.matmul %98, %99, %cst_106 {dimension_numbers = #tpu.dot_dimension_numbers<[1], [0], [0], [1], [0, 0, 1, 1], [], []>} : vector<64x256xbf16>, vector<256x128xbf16>, vector<64x128xf32> -> vector<64x128xf32>
    %c0_107 = arith.constant 0 : index
    %c0_108 = arith.constant 0 : index
    %101 = vector.load %arg9[%c0_107, %c0_108] : memref<1x128xf32, #tpu.memory_space<vmem>>, vector<1x128xf32>
    %102 = vector.broadcast %101 : vector<1x128xf32> to vector<64x128xf32>
    %103 = arith.addf %100, %102 : vector<64x128xf32>
    %104 = arith.negf %103 : vector<64x128xf32>
    %105 = math.exp %104 : vector<64x128xf32>
    %cst_109 = arith.constant 1.000000e+00 : f32
    %106 = vector.broadcast %cst_109 : f32 to vector<64x128xf32>
    %107 = arith.addf %106, %105 : vector<64x128xf32>
    %108 = arith.divf %106, %107 : vector<64x128xf32>
    %109 = vector.shape_cast %108 : vector<64x128xf32> to vector<4x16x128xf32>
    %110 = arith.truncf %109 : vector<4x16x128xf32> to vector<4x16x128xbf16>
    %c0_110 = arith.constant 0 : index
    %c0_111 = arith.constant 0 : index
    %c0_112 = arith.constant 0 : index
    %111 = vector.load %arg10[%c0_110, %c0_111, %c0_112] : memref<4x16x128xbf16, #tpu.memory_space<vmem>>, vector<4x16x128xbf16>
    tpu.vector_store %arg10[%c0_110, %c0_111, %c0_112], %110 {strides = array<i32>} : memref<4x16x128xbf16, #tpu.memory_space<vmem>>, vector<4x16x128xbf16>,
    return
  }
  func.func @transform_0(%arg0: i32) -> (i32, i32) {
    %c0_i32 = arith.constant 0 : i32
    %c0_i32_0 = arith.constant 0 : i32
    return %arg0, %c0_i32 : i32, i32
  }
  func.func @transform_1(%arg0: i32) -> (i32, i32) {
    %c0_i32 = arith.constant 0 : i32
    %c0_i32_0 = arith.constant 0 : i32
    %c0_i32_1 = arith.constant 0 : i32
    return %c0_i32, %c0_i32_0 : i32, i32
  }
  func.func @transform_2(%arg0: i32) -> (i32, i32) {
    %c0_i32 = arith.constant 0 : i32
    %c0_i32_0 = arith.constant 0 : i32
    %c0_i32_1 = arith.constant 0 : i32
    return %c0_i32, %c0_i32_0 : i32, i32
  }
  func.func @transform_3(%arg0: i32) -> (i32, i32) {
    %c0_i32 = arith.constant 0 : i32
    %c0_i32_0 = arith.constant 0 : i32
    %c0_i32_1 = arith.constant 0 : i32
    return %c0_i32, %c0_i32_0 : i32, i32
  }
  func.func @transform_4(%arg0: i32) -> (i32, i32) {
    %c0_i32 = arith.constant 0 : i32
    %c0_i32_0 = arith.constant 0 : i32
    %c0_i32_1 = arith.constant 0 : i32
    return %c0_i32, %c0_i32_0 : i32, i32
  }
  func.func @transform_5(%arg0: i32) -> (i32, i32) {
    %c0_i32 = arith.constant 0 : i32
    %c0_i32_0 = arith.constant 0 : i32
    %c0_i32_1 = arith.constant 0 : i32
    return %c0_i32, %c0_i32_0 : i32, i32
  }
  func.func @transform_6(%arg0: i32) -> (i32, i32) {
    %c0_i32 = arith.constant 0 : i32
    %c0_i32_0 = arith.constant 0 : i32
    %c0_i32_1 = arith.constant 0 : i32
    return %c0_i32, %c0_i32_0 : i32, i32
  }
  func.func @transform_7(%arg0: i32) -> (i32, i32) {
    %c0_i32 = arith.constant 0 : i32
    %c0_i32_0 = arith.constant 0 : i32
    %c0_i32_1 = arith.constant 0 : i32
    return %c0_i32, %c0_i32_0 : i32, i32
  }
  func.func @transform_8(%arg0: i32) -> (i32, i32) {
    %c0_i32 = arith.constant 0 : i32
    %c0_i32_0 = arith.constant 0 : i32
    %c0_i32_1 = arith.constant 0 : i32
    return %c0_i32, %c0_i32_0 : i32, i32
  }
  func.func @transform_9(%arg0: i32) -> (i32, i32, i32) {
    %c0_i32 = arith.constant 0 : i32
    %c0_i32_0 = arith.constant 0 : i32
    %c0_i32_1 = arith.constant 0 : i32
    return %arg0, %c0_i32, %c0_i32_0 : i32, i32, i32
  }
}

</mosaic_0001>

<bundles_post_ra>
// kernel: convreg_forward.1
= control target key start
LH: loop header
LB: loop body
LE: loop exit
PB: predicated region body
PF: predicated region fallthrough
CT: control target
= control target key end

     0   :  { %s3273_s30 = smov 0   ;;  %s3768_s0 = inlined_call_operand.vmem [shape: bf16[512,32], index: 0, kind: input, shape index: {}]   ;;  %s3769_s1 = inlined_call_operand.vmem [shape: bf16[32,64], index: 1, kind: input, shape index: {}]   ;;  %s3770_s2 = inlined_call_operand.vmem [shape: f32[1,64], index: 2, kind: input, shape index: {}]   ;;  %s3771_s3 = inlined_call_operand.vmem [shape: bf16[576,128], index: 3, kind: input, shape index: {}]   ;;  %s3772_s4 = inlined_call_operand.vmem [shape: f32[1,128], index: 4, kind: input, shape index: {}]   ;;  %s3773_s5 = inlined_call_operand.vmem [shape: bf16[128,256], index: 5, kind: input, shape index: {}]   ;;  %s3774_s6 = inlined_call_operand.vmem [shape: f32[1,256], index: 6, kind: input, shape index: {}]   ;;  %s3775_s7 = inlined_call_operand.vmem [shape: bf16[256,128], index: 7, kind: input, shape index: {}]   ;;  %s3776_s8 = inlined_call_operand.vmem [shape: f32[1,128], index: 8, kind: input, shape index: {}]   ;;  %s3777_s9 = inlined_call_operand.vmem [shape: bf16[8,16,128], index: 9, kind: output, shape index: {}]  }
   0x1 LB: > { %s2636_s10 = sadd.s32 4294967295, %s3218_s30   ;;  %p2640_p0 = scmp.ge.s32.totalorder %s3218_s30, 1  ;;  %s3218_s30 = sphi %s3273_s30, %s19_s30  }
   0x2   : > { %p288_p1 = scmp.lt.s32.totalorder %s3218_s30, 3 }
   0x4   : > { %p289_p2 = pnand %p2640_p0, %p288_p1 }
   0x5   : > { %v3014_v0 = vld [vmem:[%s3769_s1] sm:$0xff] (!%p289_p2)   ;;  %s2641_s13 = sshll.u32 (!%p289_p2), %s2636_s10, 5  ;;  %v3015_v1 = vld [vmem:[%s3769_s1 + $0x8] sm:$0xff] (!%p289_p2)   ;;  %vm572_vm0 = vcmask (!%p289_p2), 261120   ;;  %vm356_vm1 = vcmask (!%p289_p2), 516096   ;;  %v3220_v18 = vmov (!%p289_p2), 0.0  }
   0x6   : > { %292 = sbr.rel (%p289_p2) target bundleno = 1153 (0x481), region = 56  ;;  %p326_p3 = scmp.lt.s32.totalorder (!%p289_p2), %s2641_s13, 63  ;;  %2951 = vmatprep.subr.bf16.mxu0 (!%p289_p2), %v3014_v0  ;;  %378 = vst.msk [vmem:[#allocation2 + $0xa8] sm:$0x1] (!%p289_p2), %vm356_vm1, %v3220_v18  ;;  %379 = vst.msk [vmem:[#allocation2 + $0xb0] sm:$0x1] (!%p289_p2), %vm356_vm1, %v3220_v18 }
   0x7   : > { %2952 = vmatpush3.bf16.msra.mxu0 (!%p289_p2), %v3014_v0  ;;  %380 = vst.msk [vmem:[#allocation2 + $0xb8] sm:$0x1] (!%p289_p2), %vm356_vm1, %v3220_v18  ;;  %381 = vst.msk [vmem:[#allocation2 + $0xc0] sm:$0x1] (!%p289_p2), %vm356_vm1, %v3220_v18  ;;  %vm339_vm2 = vcmask (!%p289_p2), 520192   ;;  %v3040_v19 = vld [vmem:[%s3771_s3 + $0x100] sm:$0xff] (!%p289_p2)  }
   0x8   : > { %2953 = vmatprep.subr.bf16.mxu0 (!%p289_p2), %v3015_v1  ;;  %383 = vst.msk [vmem:[#allocation2 + $0xd0] sm:$0x1] (!%p289_p2), %vm356_vm1, %v3220_v18  ;;  %384 = vst.msk [vmem:[#allocation2 + $0xd8] sm:$0x1] (!%p289_p2), %vm356_vm1, %v3220_v18  ;;  %v3044_v20 = vld [vmem:[%s3771_s3 + $0x108] sm:$0xff] (!%p289_p2)   ;;  %v3048_v21 = vld [vmem:[%s3771_s3 + $0x110] sm:$0xff] (!%p289_p2)  }
   0x9   : > { %385 = vst.msk [vmem:[#allocation2 + $0xe0] sm:$0x1] (!%p289_p2), %vm356_vm1, %v3220_v18  ;;  %386 = vst.msk [vmem:[#allocation2 + $0xe8] sm:$0x1] (!%p289_p2), %vm356_vm1, %v3220_v18  ;;  %v3049_v22 = vld [vmem:[%s3771_s3 + $0x118] sm:$0xff] (!%p289_p2)   ;;  %v3076_v23 = vld [vmem:[%s3771_s3 + $0x40] sm:$0xff] (!%p289_p2)  }
   0xa   : > { %388 = vst.msk [vmem:[#allocation2 + $0xf8] sm:$0x1] (!%p289_p2), %vm356_vm1, %v3220_v18  ;;  %389 = vst.msk [vmem:[#allocation2 + $0x100] sm:$0x1] (!%p289_p2), %vm356_vm1, %v3220_v18  ;;  %v3077_v24 = vld [vmem:[%s3771_s3] sm:$0xff] (!%p289_p2)   ;;  %v3078_v25 = vld [vmem:[%s3771_s3 + $0x48] sm:$0xff] (!%p289_p2)   ;;  %2823 = vmatprep.subr.bf16.mxu1 (!%p289_p2), %v3076_v23 }
   0xb   : > { %2954 = vmatpush3.bf16.msra.mxu0 (!%p289_p2), %v3015_v1  ;;  %390 = vst.msk [vmem:[#allocation2 + $0x108] sm:$0x1] (!%p289_p2), %vm356_vm1, %v3220_v18  ;;  %391 = vst.msk [vmem:[#allocation2 + $0x110] sm:$0x1] (!%p289_p2), %vm356_vm1, %v3220_v18  ;;  %2824 = vmatpush3.bf16.msra.mxu1 (!%p289_p2), %v3077_v24  ;;  %v3079_v26 = vld [vmem:[%s3771_s3 + $0x8] sm:$0xff] (!%p289_p2)   ;;  %v3080_v27 = vld [vmem:[%s3771_s3 + $0x50] sm:$0xff] (!%p289_p2)  }
   0xc   : > { %393 = vst.msk [vmem:[#allocation2 + $0x120] sm:$0x1] (!%p289_p2), %vm356_vm1, %v3220_v18  ;;  %394 = vst.msk [vmem:[#allocation2 + $0x128] sm:$0x1] (!%p289_p2), %vm356_vm1, %v3220_v18  ;;  %2987 = vmatprep.subr.bf16.mxu0 (!%p289_p2), %v3040_v19  ;;  %2825 = vmatprep.subr.bf16.mxu1 (!%p289_p2), %v3078_v25  ;;  %v3081_v28 = vld [vmem:[%s3771_s3 + $0x10] sm:$0xff] (!%p289_p2)   ;;  %v3082_v29 = vld [vmem:[%s3771_s3 + $0x58] sm:$0xff] (!%p289_p2)  }
   0xd   : > { %s3779_s13 = smov (!%p326_p3, %s2641_s13), 63  ;;  %395 = vst.msk [vmem:[#allocation2 + $0x130] sm:$0x1] %vm356_vm1, %v3220_v18  ;;  %396 = vst.msk [vmem:[#allocation2 + $0x138] sm:$0x1] %vm356_vm1, %v3220_v18  ;;  %v3083_v30 = vld [vmem:[%s3771_s3 + $0x18] sm:$0xff]  }
   0xe   : > { %s2642_s16 = sshll.u32 %s3779_s13, 2  ;;  %418 = vst.msk [vmem:[#allocation2 + $0x1e8] sm:$0x1] %vm356_vm1, %v3220_v18  ;;  %419 = vst.msk [vmem:[#allocation2 + $0x1f0] sm:$0x1] %vm356_vm1, %v3220_v18  ;;  %v3084_v31 = vld [vmem:[%s3771_s3 + $0x60] sm:$0xff]  }
   0xf   : > { %s3292_s19 = scalar_lea.vmem %s3768_s0, %s2642_s16  ;;  %420 = vst.msk [vmem:[#allocation2 + $0x1f8] sm:$0x1] %vm356_vm1, %v3220_v18  ;;  %421 = vst.msk [vmem:[#allocation2 + $0x200] sm:$0x1] %vm356_vm1, %v3220_v18  ;;  %2826 = vmatpush3.bf16.msra.mxu1 %v3079_v26  ;;  %v3404_v32 = vld [vmem:[%s3770_s2] ss:$0 sm:$0xff] }
  0x10   : > { %v3016_v2 = vld [vmem:[%s3292_s19] sm:$0xff]   ;;  %v3017_v3 = vld [vmem:[%s3292_s19 + $0x8] sm:$0xff]   ;;  %v3018_v4 = vld [vmem:[%s3292_s19 + $0x10] sm:$0xff]   ;;  %423 = vst.msk [vmem:[#allocation2 + $0x210] sm:$0x1] %vm356_vm1, %v3220_v18  ;;  %2827 = vmatprep.subr.bf16.mxu1 %v3080_v27  ;;  %vm839_vm3 = vcmask 519168  }
  0x11   : > { %2955 = vmatprep.mubr.msk.bf16.mxu0 %vm572_vm0, %v3016_v2  ;;  %v3019_v5 = vld [vmem:[%s3292_s19 + $0x18] sm:$0xff]   ;;  %v3020_v6 = vld [vmem:[%s3292_s19 + $0x20] sm:$0xff]   ;;  %v3021_v7 = vld [vmem:[%s3292_s19 + $0x28] sm:$0xff]   ;;  %424 = vst.msk [vmem:[#allocation2 + $0x218] sm:$0x1] %vm356_vm1, %v3220_v18  ;;  %s3221_s24 = smov 64  }
  0x12   : > { %2956 = vmatmul.mubr.msk.bf16.vlgmr.msra.gmra.mrb[0].mxu0 %vm572_vm0, %v3017_v3  ;;  %v3022_v8 = vld [vmem:[%s3292_s19 + $0x30] sm:$0xff]   ;;  %v3023_v9 = vld [vmem:[%s3292_s19 + $0x38] sm:$0xff]   ;;  %v3024_v10 = vld [vmem:[%s3292_s19 + $0x40] sm:$0xff]   ;;  %425 = vst.msk [vmem:[#allocation2 + $0x220] sm:$0x1] %vm356_vm1, %v3220_v18  ;;  %vm1032_vm4 = vcmask 523264  }
  0x13   : > { %2959 = vmatprep.mubr.msk.bf16.mxu0 %vm572_vm0, %v3018_v4  ;;  %v3025_v11 = vld [vmem:[%s3292_s19 + $0x48] sm:$0xff]   ;;  %v3026_v12 = vld [vmem:[%s3292_s19 + $0x50] sm:$0xff]   ;;  %v3027_v13 = vld [vmem:[%s3292_s19 + $0x58] sm:$0xff]   ;;  %426 = vst.msk [vmem:[#allocation2 + $0x228] sm:$0x1] %vm356_vm1, %v3220_v18  ;;  %2988 = vmatpush3.bf16.msra.mxu0 %v3040_v19  ;;  %vm1106_vm5 = vcmask 1048064  }
  0x14   : > { %v3028_v14 = vld [vmem:[%s3292_s19 + $0x60] sm:$0xff]   ;;  %v3029_v15 = vld [vmem:[%s3292_s19 + $0x68] sm:$0xff]   ;;  %v3030_v16 = vld [vmem:[%s3292_s19 + $0x70] sm:$0xff]   ;;  %428 = vst.msk [vmem:[#allocation2 + $0x238] sm:$0x1] %vm356_vm1, %v3220_v18  ;;  %2989 = vmatprep.subr.bf16.mxu0 %v3044_v20  ;;  %2828 = vmatpush3.bf16.msra.mxu1 %v3081_v28  ;;  %s2643_s13 = sshll.u32 %s2636_s10, 2 }
  0x15   : > { %v3031_v17 = vld [vmem:[%s3292_s19 + $0x78] sm:$0xff]   ;;  %429 = vst.msk [vmem:[#allocation2 + $0x240] sm:$0x1] %vm356_vm1, %v3220_v18  ;;  %430 = vst.msk [vmem:[#allocation2 + $0x248] sm:$0x1] %vm356_vm1, %v3220_v18  ;;  %2829 = vmatprep.subr.bf16.mxu1 %v3082_v29  ;;  %v3087_v48 = vld [vmem:[%s3771_s3 + $0x20] sm:$0xff]  }
  0x16   : > { %431 = vst.msk [vmem:[#allocation2 + $0x250] sm:$0x1] %vm356_vm1, %v3220_v18  ;;  %433 = vst.msk [vmem:[#allocation2 + $0x260] sm:$0x1] %vm356_vm1, %v3220_v18  ;;  %v3088_v49 = vld [vmem:[%s3771_s3 + $0x68] sm:$0xff]   ;;  %p332_p4 = scmp.lt.s32.totalorder %s2643_s13, 7 }
  0x17   : > { %434 = vst.msk [vmem:[#allocation2 + $0x268] sm:$0x1] %vm356_vm1, %v3220_v18  ;;  %435 = vst.msk [vmem:[#allocation2 + $0x270] sm:$0x1] %vm356_vm1, %v3220_v18  ;;  %2990 = vmatpush3.bf16.msra.mxu0 %v3044_v20  ;;  %v3089_v54 = vld [vmem:[%s3771_s3 + $0x28] sm:$0xff]  }
  0x18   : > { %436 = vst.msk [vmem:[#allocation2 + $0x278] sm:$0x1] %vm356_vm1, %v3220_v18  ;;  %2991 = vmatprep.subr.bf16.mxu0 %v3048_v21  ;;  %2830 = vmatpush3.bf16.msra.mxu1 %v3083_v30  ;;  %s3781_s13 = smov (!%p332_p4, %s2643_s13), 7 }
  0x19   : > { %348 = vst.msk [vmem:[#allocation2 + $0x140] sm:$0x1f] %vm339_vm2, %v3220_v18  ;;  %349 = vst.msk [vmem:[#allocation2 + $0x168] sm:$0x1f] %vm339_vm2, %v3220_v18  ;;  %2831 = vmatprep.subr.bf16.mxu1 %v3084_v31  ;;  %s2773_s10 = sshll.u32 %s3781_s13, 3 }
  0x1a   : > { %2960 = vmatmul.mubr.msk.bf16.gmra.mrb[4].mxu0 %vm572_vm0, %v3019_v5  ;;  %350 = vst.msk [vmem:[#allocation2 + $0x190] sm:$0x1f] %vm339_vm2, %v3220_v18  ;;  %351 = vst.msk [vmem:[#allocation2 + $0x1b8] sm:$0x1f] %vm339_vm2, %v3220_v18  ;;  %s336_s16 = scalar_lea.vmem %s3777_s9, %s2773_s10 }
  0x1b   : > { %2963 = vmatprep.mubr.msk.bf16.mxu0 %vm572_vm0, %v3020_v6  ;;  %352 = vst.msk [vmem:[#allocation2 + $0x1e0] sm:$0x1f] %vm339_vm2, %v3220_v18  ;;  %353 = vst.msk [vmem:[#allocation2 + $0x208] sm:$0x1f] %vm339_vm2, %v3220_v18  ;;  %2992 = vmatpush3.bf16.msra.mxu0 %v3048_v21 }
  0x1c   : > { %354 = vst.msk [vmem:[#allocation2 + $0x230] sm:$0x1f] %vm339_vm2, %v3220_v18  ;;  %355 = vst.msk [vmem:[#allocation2 + $0x258] sm:$0x1f] %vm339_vm2, %v3220_v18  ;;  %2993 = vmatprep.subr.bf16.mxu0 %v3049_v22  ;;  %2832 = vmatpush3.bf16.msra.mxu1 %v3087_v48 }
  0x1d   : > { %417 = vst.msk [vmem:[#allocation2 + $0x1e0] sm:$0x1] %vm356_vm1, %v3220_v18  ;;  %422 = vst.msk [vmem:[#allocation2 + $0x208] sm:$0x1] %vm356_vm1, %v3220_v18  ;;  %2833 = vmatprep.subr.bf16.mxu1 %v3088_v49 }
  0x1e   : > { %427 = vst.msk [vmem:[#allocation2 + $0x230] sm:$0x1] %vm356_vm1, %v3220_v18  ;;  %432 = vst.msk [vmem:[#allocation2 + $0x258] sm:$0x1] %vm356_vm1, %v3220_v18 }
  0x1f   : > { %2994 = vmatpush3.bf16.msra.mxu0 %v3049_v22 }
  0x20   : > { %2834 = vmatpush3.bf16.msra.mxu1 %v3089_v54 }
  0x22   : > { %2964 = vmatmul.mubr.msk.bf16.gmra.mrb[8].mxu0 %vm572_vm0, %v3021_v7  ;;  %v3092_v7 = vld [vmem:[%s3771_s3 + $0x70] sm:$0xff]  }
  0x23   : > { %2967 = vmatprep.mubr.msk.bf16.mxu0 %vm572_vm0, %v3022_v8  ;;  %2835 = vmatprep.subr.bf16.mxu1 %v3092_v7 }
  0x2a   : > { %2968 = vmatmul.mubr.msk.bf16.gmra.mrb[12].mxu0 %vm572_vm0, %v3023_v9 }
  0x2b   : > { %2971 = vmatprep.mubr.msk.bf16.mxu0 %vm572_vm0, %v3024_v10  ;;  %v3093_v10 = vld [vmem:[%s3771_s3 + $0x30] sm:$0xff]  }
  0x2c   : > { %2836 = vmatpush3.bf16.msra.mxu1 %v3093_v10 }
  0x32   : > { %2972 = vmatmul.mubr.msk.bf16.gmra.mrb[16].mxu0 %vm572_vm0, %v3025_v11 }
  0x33   : > { %2975 = vmatprep.mubr.msk.bf16.mxu0 %vm572_vm0, %v3026_v12 }
  0x3a   : > { %2976 = vmatmul.mubr.msk.bf16.gmra.mrb[20].mxu0 %vm572_vm0, %v3027_v13 }
  0x3b   : > { %2979 = vmatprep.mubr.msk.bf16.mxu0 %vm572_vm0, %v3028_v14  ;;  %v3094_v14 = vld [vmem:[%s3771_s3 + $0x78] sm:$0xff]  }
  0x3c   : > { %2837 = vmatprep.subr.bf16.mxu1 %v3094_v14 }
  0x42   : > { %2980 = vmatmul.mubr.msk.bf16.gmra.mrb[24].mxu0 %vm572_vm0, %v3029_v15  ;;  %v3095_v15 = vld [vmem:[%s3771_s3 + $0x38] sm:$0xff]  }
  0x43   : > { %2983 = vmatprep.mubr.msk.bf16.mxu0 %vm572_vm0, %v3030_v16  ;;  %2838 = vmatpush3.bf16.msra.mxu1 %v3095_v15 }
  0x4a   : > { %2984 = vmatmul.mubr.msk.bf16.gmra.mrb[28].mxu0 %vm572_vm0, %v3031_v17 }
  0xe5   : > { %v2957_v33 = vpop.f32.mrb[0].mxu0 }
  0xe6   : > { %v664_v34 = vadd.f32 %v2957_v33, %v3404_v32  ;;  %v655_v35 = vpop.f32.mrb[1].mxu0 }
  0xe7   : > { %v656_v36 = vadd.f32 %v3404_v32, %v655_v35  ;;  %v2958_v37 = vpop.f32.mrb[2].mxu0 }
  0xe8   : > { %v784_v38 = vmax.f32 %v664_v34, 0.0  ;;  %v667_v39 = vadd.f32 %v2958_v37, %v3404_v32  ;;  %v658_v40 = vpop.f32.mrb[3].mxu0 }
  0xe9   : > { %v782_v41 = vmax.f32 %v656_v36, 0.0  ;;  %v659_v42 = vadd.f32 %v3404_v32, %v658_v40 }
  0xea   : > { %v864_v43 = vcombine.high %v784_v38, %v784_v38  ;;  %881 = vst.msk [vmem:[#allocation2 + $0xa9] sm:$0xf] %vm839_vm3, %v784_v38  ;;  %v785_v44 = vmax.f32 %v667_v39, 0.0 }
  0xeb   : > { %v822_v45 = vcombine.high %v782_v41, %v782_v41  ;;  %840 = vst.msk [vmem:[#allocation2 + $0x9] sm:$0xf] %vm839_vm3, %v782_v41  ;;  %v783_v46 = vmax.f32 %v659_v42, 0.0 }
  0xec   : > { %882 = vst.msk [vmem:[#allocation2 + $0xb1] sm:$0xf] %vm839_vm3, %v864_v43  ;;  %v865_v47 = vcombine.high %v785_v44, %v785_v44  ;;  %883 = vst.msk [vmem:[#allocation2 + $0xb9] sm:$0xf] %vm839_vm3, %v785_v44 }
  0xed   : > { %841 = vst.msk [vmem:[#allocation2 + $0x11] sm:$0xf] %vm839_vm3, %v822_v45  ;;  %v823_v50 = vcombine.high %v783_v46, %v783_v46  ;;  %842 = vst.msk [vmem:[#allocation2 + $0x19] sm:$0xf] %vm839_vm3, %v783_v46  ;;  %v2961_v51 = vpop.f32.mrb[4].mxu0 }
  0xee   : > { %884 = vst.msk [vmem:[#allocation2 + $0xc1] sm:$0xf] %vm839_vm3, %v865_v47  ;;  %v680_v52 = vadd.f32 %v2961_v51, %v3404_v32  ;;  %v671_v53 = vpop.f32.mrb[5].mxu0 }
  0xef   : > { %843 = vst.msk [vmem:[#allocation2 + $0x21] sm:$0xf] %vm839_vm3, %v823_v50  ;;  %v672_v55 = vadd.f32 %v3404_v32, %v671_v53  ;;  %v2962_v56 = vpop.f32.mrb[6].mxu0 }
  0xf0   : > { %v788_v57 = vmax.f32 %v680_v52, 0.0  ;;  %v683_v58 = vadd.f32 %v2962_v56, %v3404_v32  ;;  %v674_v59 = vpop.f32.mrb[7].mxu0 }
  0xf1   : > { %v786_v60 = vmax.f32 %v672_v55, 0.0  ;;  %v675_v61 = vadd.f32 %v3404_v32, %v674_v59 }
  0xf2   : > { %v946_v62 = vcombine.high %v788_v57, %v788_v57  ;;  %963 = vst.msk [vmem:[#allocation2 + $0x1e9] sm:$0xf] %vm839_vm3, %v788_v57  ;;  %v789_v63 = vmax.f32 %v683_v58, 0.0 }
  0xf3   : > { %v905_v0 = vcombine.high %v786_v60, %v786_v60  ;;  %922 = vst.msk [vmem:[#allocation2 + $0x149] sm:$0xf] %vm839_vm3, %v786_v60  ;;  %v787_v1 = vmax.f32 %v675_v61, 0.0  ;;  %v3034_v3 = vld [vmem:[#allocation2 + $0xa8] ss:$8 sps:$4 sm:$0xff]  }
  0xf4   : > { %964 = vst.msk [vmem:[#allocation2 + $0x1f1] sm:$0xf] %vm839_vm3, %v946_v62  ;;  %v947_v2 = vcombine.high %v789_v63, %v789_v63  ;;  %965 = vst.msk [vmem:[#allocation2 + $0x1f9] sm:$0xf] %vm839_vm3, %v789_v63 }
  0xf5   : > { %923 = vst.msk [vmem:[#allocation2 + $0x151] sm:$0xf] %vm839_vm3, %v905_v0  ;;  %v906_v4 = vcombine.high %v787_v1, %v787_v1  ;;  %924 = vst.msk [vmem:[#allocation2 + $0x159] sm:$0xf] %vm839_vm3, %v787_v1  ;;  %v2965_v5 = vpop.f32.mrb[8].mxu0 }
  0xf6   : > { %v3035_v6 = vld [vmem:[#allocation2 + $0xb8] ss:$8 sps:$4 sm:$0xff]   ;;  %966 = vst.msk [vmem:[#allocation2 + $0x201] sm:$0xf] %vm839_vm3, %v947_v2  ;;  %v696_v8 = vadd.f32 %v2965_v5, %v3404_v32  ;;  %v687_v9 = vpop.f32.mrb[9].mxu0 }
  0xf7   : > { %925 = vst.msk [vmem:[#allocation2 + $0x161] sm:$0xf] %vm839_vm3, %v906_v4  ;;  %v688_v11 = vadd.f32 %v3404_v32, %v687_v9  ;;  %v2966_v12 = vpop.f32.mrb[10].mxu0  ;;  %v1215_v13 = vpack.c.bf16 %v3035_v6, %v3034_v3 }
  0xf8   : > { %v792_v16 = vmax.f32 %v696_v8, 0.0  ;;  %v699_v17 = vadd.f32 %v2966_v12, %v3404_v32  ;;  %v690_v18 = vpop.f32.mrb[11].mxu0  ;;  %v3102_v12 = vld [vmem:[%s3771_s3 + $0xc0] sm:$0xff]  }
  0xf9   : > { %v790_v19 = vmax.f32 %v688_v11, 0.0  ;;  %v691_v20 = vadd.f32 %v3404_v32, %v690_v18  ;;  %1223 = vrot.lane.b32.xlu0 %v1215_v13, %s3221_s24  ;;  %v3085_v62 = vld [vmem:[#allocation2 + $0x1e1] ss:$8 sps:$4 sm:$0xff]   ;;  %2863 = vmatprep.subr.bf16.mxu1 %v3102_v12 }
  0xfa   : > { %v866_v21 = vcombine.high %v792_v16, %v792_v16  ;;  %885 = vst.msk [vmem:[#allocation2 + $0xd1] sm:$0xf] %vm839_vm3, %v792_v16  ;;  %v793_v22 = vmax.f32 %v699_v17, 0.0  ;;  %v3038_v27 = vld [vmem:[#allocation2 + $0x141] ss:$8 sps:$4 sm:$0xff]  }
  0xfb   : > { %v3032_v23 = vld [vmem:[#allocation2 + $0x1e9] ss:$8 sps:$4 sm:$0xff]   ;;  %v824_v24 = vcombine.high %v790_v19, %v790_v19  ;;  %844 = vst.msk [vmem:[#allocation2 + $0x31] sm:$0xf] %vm839_vm3, %v790_v19  ;;  %v791_v26 = vmax.f32 %v691_v20, 0.0 }
  0xfc   : > { %886 = vst.msk [vmem:[#allocation2 + $0xd9] sm:$0xf] %vm839_vm3, %v866_v21  ;;  %v867_v25 = vcombine.high %v793_v22, %v793_v22  ;;  %887 = vst.msk [vmem:[#allocation2 + $0xe1] sm:$0xf] %vm839_vm3, %v793_v22  ;;  %v3039_v34 = vld [vmem:[#allocation2 + $0x151] ss:$8 sps:$4 sm:$0xff]  }
  0xfd   : > { %v3033_v28 = vld [vmem:[#allocation2 + $0x1f9] ss:$8 sps:$4 sm:$0xff]   ;;  %845 = vst.msk [vmem:[#allocation2 + $0x39] sm:$0xf] %vm839_vm3, %v824_v24  ;;  %v2969_v29 = vpop.f32.mrb[12].mxu0  ;;  %v825_v30 = vcombine.high %v791_v26, %v791_v26  ;;  %v1086_v41 = vpack.c.bf16 %v3039_v34, %v3038_v27 }
  0xfe   : > { %888 = vst.msk [vmem:[#allocation2 + $0xe9] sm:$0xf] %vm839_vm3, %v867_v25  ;;  %846 = vst.msk [vmem:[#allocation2 + $0x41] sm:$0xf] %vm839_vm3, %v791_v26  ;;  %v712_v31 = vadd.f32 %v2969_v29, %v3404_v32  ;;  %v703_v33 = vpop.f32.mrb[13].mxu0  ;;  %v1543_v37 = vpack.c.bf16 %v3033_v28, %v3032_v23 }
  0xff   : > { %v704_v35 = vadd.f32 %v3404_v32, %v703_v33  ;;  %v2970_v36 = vpop.f32.mrb[14].mxu0  ;;  %847 = vst.msk [vmem:[#allocation2 + $0x49] sm:$0xf] %vm839_vm3, %v825_v30  ;;  %1094 = vrot.lane.b32.xlu0 %v1086_v41, %s3221_s24  ;;  %v3086_v1 = vld [vmem:[#allocation2 + $0x1f1] ss:$8 sps:$4 sm:$0xff]  }
 0x100   : > { %v796_v38 = vmax.f32 %v712_v31, 0.0  ;;  %v715_v39 = vadd.f32 %v2970_v36, %v3404_v32  ;;  %v706_v40 = vpop.f32.mrb[15].mxu0  ;;  %1547 = vst.msk [vmem:[#allocation3 + $0x20] sm:$0xff] %vm1032_vm4, %v1543_v37  ;;  %v1159_v6 = vpack.c.bf16 %v3086_v1, %v3085_v62 }
 0x101   : > { %v794_v42 = vmax.f32 %v704_v35, 0.0  ;;  %v707_v43 = vadd.f32 %v3404_v32, %v706_v40 }
 0x102   : > { %v948_v44 = vcombine.high %v796_v38, %v796_v38  ;;  %967 = vst.msk [vmem:[#allocation2 + $0x211] sm:$0xf] %vm839_vm3, %v796_v38  ;;  %v797_v45 = vmax.f32 %v715_v39, 0.0 }
 0x103   : > { %v907_v46 = vcombine.high %v794_v42, %v794_v42  ;;  %926 = vst.msk [vmem:[#allocation2 + $0x171] sm:$0xf] %vm839_vm3, %v794_v42  ;;  %v795_v47 = vmax.f32 %v707_v43, 0.0  ;;  %v3041_v49 = vld [vmem:[#allocation2 + $0xd0] ss:$8 sps:$4 sm:$0xff]  }
 0x104   : > { %968 = vst.msk [vmem:[#allocation2 + $0x219] sm:$0xf] %vm839_vm3, %v948_v44  ;;  %v949_v48 = vcombine.high %v797_v45, %v797_v45  ;;  %969 = vst.msk [vmem:[#allocation2 + $0x221] sm:$0xf] %vm839_vm3, %v797_v45 }
 0x105   : > { %927 = vst.msk [vmem:[#allocation2 + $0x179] sm:$0xf] %vm839_vm3, %v907_v46  ;;  %v908_v50 = vcombine.high %v795_v47, %v795_v47  ;;  %928 = vst.msk [vmem:[#allocation2 + $0x181] sm:$0xf] %vm839_vm3, %v795_v47  ;;  %v2973_v51 = vpop.f32.mrb[16].mxu0 }
 0x106   : > { %v3042_v52 = vld [vmem:[#allocation2 + $0xe0] ss:$8 sps:$4 sm:$0xff]   ;;  %970 = vst.msk [vmem:[#allocation2 + $0x229] sm:$0xf] %vm839_vm3, %v949_v48  ;;  %v728_v53 = vadd.f32 %v2973_v51, %v3404_v32  ;;  %v719_v54 = vpop.f32.mrb[17].mxu0 }
 0x107   : > { %929 = vst.msk [vmem:[#allocation2 + $0x189] sm:$0xf] %vm839_vm3, %v908_v50  ;;  %v720_v55 = vadd.f32 %v3404_v32, %v719_v54  ;;  %v2974_v56 = vpop.f32.mrb[18].mxu0  ;;  %v1216_v57 = vpack.c.bf16 %v3042_v52, %v3041_v49  ;;  %v1555_v61 = vld [vmem:[#allocation3 + $0x20] sm:$0xff] }
 0x108   : > { %v800_v58 = vmax.f32 %v728_v53, 0.0  ;;  %v731_v59 = vadd.f32 %v2974_v56, %v3404_v32  ;;  %v722_v60 = vpop.f32.mrb[19].mxu0  ;;  %2995 = vmatprep.mubr.msk.bf16.mxu0 %vm1032_vm4, %v1555_v61  ;;  %1163 = vst.msk [vmem:[#allocation3 + $0x8] sm:$0xff] %vm1032_vm4, %v1159_v6 }
 0x109   : > { %v798_v63 = vmax.f32 %v720_v55, 0.0  ;;  %v723_v0 = vadd.f32 %v3404_v32, %v722_v60  ;;  %1225 = vrot.lane.b32.xlu1 %v1216_v57, %s3221_s24 }
 0x10a   : > { %v868_v2 = vcombine.high %v800_v58, %v800_v58  ;;  %889 = vst.msk [vmem:[#allocation2 + $0xf9] sm:$0xf] %vm839_vm3, %v800_v58  ;;  %v801_v3 = vmax.f32 %v731_v59, 0.0  ;;  %v3046_v9 = vld [vmem:[#allocation2 + $0x169] ss:$8 sps:$4 sm:$0xff]  }
 0x10b   : > { %v3036_v4 = vld [vmem:[#allocation2 + $0x211] ss:$8 sps:$4 sm:$0xff]   ;;  %v826_v5 = vcombine.high %v798_v63, %v798_v63  ;;  %848 = vst.msk [vmem:[#allocation2 + $0x59] sm:$0xf] %vm839_vm3, %v798_v63  ;;  %v799_v8 = vmax.f32 %v723_v0, 0.0 }
 0x10c   : > { %890 = vst.msk [vmem:[#allocation2 + $0x101] sm:$0xf] %vm839_vm3, %v868_v2  ;;  %v869_v7 = vcombine.high %v801_v3, %v801_v3  ;;  %891 = vst.msk [vmem:[#allocation2 + $0x109] sm:$0xf] %vm839_vm3, %v801_v3  ;;  %v3047_v16 = vld [vmem:[#allocation2 + $0x179] ss:$8 sps:$4 sm:$0xff]  }
 0x10d   : > { %v3037_v10 = vld [vmem:[#allocation2 + $0x221] ss:$8 sps:$4 sm:$0xff]   ;;  %849 = vst.msk [vmem:[#allocation2 + $0x61] sm:$0xf] %vm839_vm3, %v826_v5  ;;  %v2977_v11 = vpop.f32.mrb[20].mxu0  ;;  %v827_v13 = vcombine.high %v799_v8, %v799_v8  ;;  %v1087_v23 = vpack.c.bf16 %v3047_v16, %v3046_v9 }
 0x10e   : > { %892 = vst.msk [vmem:[#allocation2 + $0x111] sm:$0xf] %vm839_vm3, %v869_v7  ;;  %850 = vst.msk [vmem:[#allocation2 + $0x69] sm:$0xf] %vm839_vm3, %v799_v8  ;;  %v744_v14 = vadd.f32 %v2977_v11, %v3404_v32  ;;  %v735_v15 = vpop.f32.mrb[21].mxu0  ;;  %v1544_v17 = vpack.c.bf16 %v3037_v10, %v3036_v4 }
 0x10f   : > { %v736_v18 = vadd.f32 %v3404_v32, %v735_v15  ;;  %v2978_v19 = vpop.f32.mrb[22].mxu0  ;;  %851 = vst.msk [vmem:[#allocation2 + $0x71] sm:$0xf] %vm839_vm3, %v827_v13  ;;  %1096 = vrot.lane.b32.xlu1 %v1087_v23, %s3221_s24  ;;  %v3090_v5 = vld [vmem:[#allocation2 + $0x1e0] ss:$8 sps:$4 sm:$0xff]  }
 0x110   : > { %v804_v20 = vmax.f32 %v744_v14, 0.0  ;;  %v747_v21 = vadd.f32 %v2978_v19, %v3404_v32  ;;  %v738_v22 = vpop.f32.mrb[23].mxu0  ;;  %1548 = vst.msk [vmem:[#allocation3 + $0x48] sm:$0xff] %vm1032_vm4, %v1544_v17  ;;  %v3091_v8 = vld [vmem:[#allocation2 + $0x1f0] ss:$8 sps:$4 sm:$0xff]  }
 0x111   : > { %v802_v24 = vmax.f32 %v736_v18, 0.0  ;;  %v739_v25 = vadd.f32 %v3404_v32, %v738_v22  ;;  %v1028_v12 = vpack.c.bf16 %v3091_v8, %v3090_v5  ;;  %v3059_v15 = vld [vmem:[#allocation2 + $0x159] ss:$8 sps:$4 sm:$0xff]   ;;  %v3058_v17 = vld [vmem:[#allocation2 + $0x149] ss:$8 sps:$4 sm:$0xff]  }
 0x112   : > { %v950_v26 = vcombine.high %v804_v20, %v804_v20  ;;  %971 = vst.msk [vmem:[#allocation2 + $0x239] sm:$0xf] %vm839_vm3, %v804_v20  ;;  %v805_v27 = vmax.f32 %v747_v21, 0.0  ;;  %v3096_v18 = vld [vmem:[#allocation2 + $0x209] ss:$8 sps:$4 sm:$0xff]  }
 0x113   : > { %v909_v28 = vcombine.high %v802_v24, %v802_v24  ;;  %930 = vst.msk [vmem:[#allocation2 + $0x199] sm:$0xf] %vm839_vm3, %v802_v24  ;;  %v803_v29 = vmax.f32 %v739_v25, 0.0  ;;  %v3050_v31 = vld [vmem:[#allocation2 + $0xf8] ss:$8 sps:$4 sm:$0xff]   ;;  %v1471_v25 = vpack.c.bf16 %v3059_v15, %v3058_v17 }
 0x114   : > { %972 = vst.msk [vmem:[#allocation2 + $0x241] sm:$0xf] %vm839_vm3, %v950_v26  ;;  %v951_v30 = vcombine.high %v805_v27, %v805_v27  ;;  %973 = vst.msk [vmem:[#allocation2 + $0x249] sm:$0xf] %vm839_vm3, %v805_v27  ;;  %v3097_v20 = vld [vmem:[#allocation2 + $0x219] ss:$8 sps:$4 sm:$0xff]  }
 0x115   : > { %931 = vst.msk [vmem:[#allocation2 + $0x1a1] sm:$0xf] %vm839_vm3, %v909_v28  ;;  %v910_v33 = vcombine.high %v803_v29, %v803_v29  ;;  %932 = vst.msk [vmem:[#allocation2 + $0x1a9] sm:$0xf] %vm839_vm3, %v803_v29  ;;  %v2981_v34 = vpop.f32.mrb[24].mxu0  ;;  %v1160_v23 = vpack.c.bf16 %v3097_v20, %v3096_v18 }
 0x116   : > { %v3051_v35 = vld [vmem:[#allocation2 + $0x108] ss:$8 sps:$4 sm:$0xff]   ;;  %974 = vst.msk [vmem:[#allocation2 + $0x251] sm:$0xf] %vm839_vm3, %v951_v30  ;;  %v760_v36 = vadd.f32 %v2981_v34, %v3404_v32  ;;  %v751_v37 = vpop.f32.mrb[25].mxu0 }
 0x117   : > { %933 = vst.msk [vmem:[#allocation2 + $0x1b1] sm:$0xf] %vm839_vm3, %v910_v33  ;;  %v752_v38 = vadd.f32 %v3404_v32, %v751_v37  ;;  %v2982_v39 = vpop.f32.mrb[26].mxu0  ;;  %v1217_v40 = vpack.c.bf16 %v3051_v35, %v3050_v31  ;;  %v1560_v44 = vld [vmem:[#allocation3 + $0x48] sm:$0xff]  ;;  %v3062_v26 = vld [vmem:[#allocation2 + $0x171] ss:$8 sps:$4 sm:$0xff]  }
 0x118   : > { %v808_v41 = vmax.f32 %v760_v36, 0.0  ;;  %v763_v42 = vadd.f32 %v2982_v39, %v3404_v32  ;;  %v754_v43 = vpop.f32.mrb[27].mxu0  ;;  %2996 = vmatmul.mubr.msk.bf16.vlgmr.msra.gmra.mrb[32].mxu0 %vm1032_vm4, %v1560_v44  ;;  %1033 = vst.msk [vmem:[#allocation3] sm:$0xff] %vm1032_vm4, %v1028_v12  ;;  %v3063_v21 = vld [vmem:[#allocation2 + $0x181] ss:$8 sps:$4 sm:$0xff]   ;;  %1164 = vst.msk [vmem:[#allocation3 + $0x30] sm:$0xff] %vm1032_vm4, %v1160_v23 }
 0x119   : > { %v806_v45 = vmax.f32 %v752_v38, 0.0  ;;  %v755_v46 = vadd.f32 %v3404_v32, %v754_v43  ;;  %1227 = vrot.lane.b32.xlu0 %v1217_v40, %s3221_s24  ;;  %v3064_v30 = vld [vmem:[#allocation2 + $0xa9] ss:$8 sps:$4 sm:$0xff]   ;;  %v3065_v31 = vld [vmem:[#allocation2 + $0xb9] ss:$8 sps:$4 sm:$0xff]   ;;  %v1472_v33 = vpack.c.bf16 %v3063_v21, %v3062_v26 }
 0x11a   : > { %v870_v47 = vcombine.high %v808_v41, %v808_v41  ;;  %893 = vst.msk [vmem:[#allocation2 + $0x121] sm:$0xf] %vm839_vm3, %v808_v41  ;;  %v809_v48 = vmax.f32 %v763_v42, 0.0  ;;  %v3054_v53 = vld [vmem:[#allocation2 + $0x191] ss:$8 sps:$4 sm:$0xff]   ;;  %v1343_v44 = vpack.c.bf16 %v3065_v31, %v3064_v30  ;;  %v3106_v31 = vld [vmem:[%s3771_s3 + $0xc8] sm:$0xff]  }
 0x11b   : > { %v3043_v49 = vld [vmem:[#allocation2 + $0x239] ss:$8 sps:$4 sm:$0xff]   ;;  %v828_v50 = vcombine.high %v806_v45, %v806_v45  ;;  %852 = vst.msk [vmem:[#allocation2 + $0x81] sm:$0xf] %vm839_vm3, %v806_v45  ;;  %v807_v52 = vmax.f32 %v755_v46, 0.0 }
 0x11c   : > { %894 = vst.msk [vmem:[#allocation2 + $0x129] sm:$0xf] %vm839_vm3, %v870_v47  ;;  %v871_v51 = vcombine.high %v809_v48, %v809_v48  ;;  %895 = vst.msk [vmem:[#allocation2 + $0x131] sm:$0xf] %vm839_vm3, %v809_v48  ;;  %v3055_v59 = vld [vmem:[#allocation2 + $0x1a1] ss:$8 sps:$4 sm:$0xff]  }
 0x11d   : > { %v3045_v54 = vld [vmem:[#allocation2 + $0x249] ss:$8 sps:$4 sm:$0xff]   ;;  %853 = vst.msk [vmem:[#allocation2 + $0x89] sm:$0xf] %vm839_vm3, %v828_v50  ;;  %v2985_v55 = vpop.f32.mrb[28].mxu0  ;;  %v829_v56 = vcombine.high %v807_v52, %v807_v52  ;;  %v1088_v2 = vpack.c.bf16 %v3055_v59, %v3054_v53 }
 0x11e   : > { %896 = vst.msk [vmem:[#allocation2 + $0x139] sm:$0xf] %vm839_vm3, %v871_v51  ;;  %854 = vst.msk [vmem:[#allocation2 + $0x91] sm:$0xf] %vm839_vm3, %v807_v52  ;;  %v776_v57 = vadd.f32 %v2985_v55, %v3404_v32  ;;  %v767_v58 = vpop.f32.mrb[29].mxu0  ;;  %v1545_v62 = vpack.c.bf16 %v3045_v54, %v3043_v49 }
 0x11f   : > { %v768_v60 = vadd.f32 %v3404_v32, %v767_v58  ;;  %v2986_v61 = vpop.f32.mrb[30].mxu0  ;;  %855 = vst.msk [vmem:[#allocation2 + $0x99] sm:$0xf] %vm839_vm3, %v829_v56  ;;  %1098 = vrot.lane.b32.xlu1 %v1088_v2, %s3221_s24  ;;  %v3066_v34 = vld [vmem:[#allocation2 + $0x199] ss:$8 sps:$4 sm:$0xff]  }
 0x120   : > { %v812_v63 = vmax.f32 %v776_v57, 0.0  ;;  %v779_v0 = vadd.f32 %v2986_v61, %v3404_v32  ;;  %v770_v1 = vpop.f32.mrb[31].mxu0  ;;  %1549 = vst.msk [vmem:[#allocation3 + $0x70] sm:$0xff] %vm1032_vm4, %v1545_v62  ;;  %v3067_v35 = vld [vmem:[#allocation2 + $0x1a9] ss:$8 sps:$4 sm:$0xff]  }
 0x121   : > { %v810_v3 = vmax.f32 %v768_v60, 0.0  ;;  %v771_v4 = vadd.f32 %v3404_v32, %v770_v1  ;;  %v3098_v37 = vld [vmem:[#allocation2 + $0x208] ss:$8 sps:$4 sm:$0xff]   ;;  %v3099_v38 = vld [vmem:[#allocation2 + $0x218] ss:$8 sps:$4 sm:$0xff]   ;;  %v1473_v47 = vpack.c.bf16 %v3067_v35, %v3066_v34 }
 0x122   : > { %v952_v6 = vcombine.high %v812_v63, %v812_v63  ;;  %975 = vst.msk [vmem:[#allocation2 + $0x261] sm:$0xf] %vm839_vm3, %v812_v63  ;;  %v813_v7 = vmax.f32 %v779_v0, 0.0  ;;  %v3069_v39 = vld [vmem:[#allocation2 + $0xe1] ss:$8 sps:$4 sm:$0xff]   ;;  %v1029_v41 = vpack.c.bf16 %v3099_v38, %v3098_v37  ;;  %v3108_v35 = vld [vmem:[%s3771_s3 + $0xd0] sm:$0xff]  }
 0x123   : > { %v911_v9 = vcombine.high %v810_v3, %v810_v3  ;;  %934 = vst.msk [vmem:[#allocation2 + $0x1c1] sm:$0xf] %vm839_vm3, %v810_v3  ;;  %v811_v10 = vmax.f32 %v771_v4, 0.0  ;;  %v3056_v32 = vld [vmem:[#allocation2 + $0x120] ss:$8 sps:$4 sm:$0xff]   ;;  %v3112_v38 = vld [vmem:[%s3771_s3 + $0xd8] sm:$0xff]  }
 0x124   : > { %976 = vst.msk [vmem:[#allocation2 + $0x269] sm:$0xf] %vm839_vm3, %v952_v6  ;;  %v953_v11 = vcombine.high %v813_v7, %v813_v7  ;;  %977 = vst.msk [vmem:[#allocation2 + $0x271] sm:$0xf] %vm839_vm3, %v813_v7  ;;  %v3100_v42 = vld [vmem:[#allocation2 + $0x231] ss:$8 sps:$4 sm:$0xff]  }
 0x125   : > { %935 = vst.msk [vmem:[#allocation2 + $0x1c9] sm:$0xf] %vm839_vm3, %v911_v9  ;;  %v912_v13 = vcombine.high %v811_v10, %v811_v10  ;;  %936 = vst.msk [vmem:[#allocation2 + $0x1d1] sm:$0xf] %vm839_vm3, %v811_v10  ;;  %v3057_v14 = vld [vmem:[#allocation2 + $0x130] ss:$8 sps:$4 sm:$0xff]  }
 0x126   : > { %978 = vst.msk [vmem:[#allocation2 + $0x279] sm:$0xf] %vm839_vm3, %v953_v11  ;;  %v1218_v16 = vpack.c.bf16 %v3057_v14, %v3056_v32  ;;  %v3101_v43 = vld [vmem:[#allocation2 + $0x241] ss:$8 sps:$4 sm:$0xff]   ;;  %v3068_v45 = vld [vmem:[#allocation2 + $0xd1] ss:$8 sps:$4 sm:$0xff]  }
 0x127   : > { %937 = vst.msk [vmem:[#allocation2 + $0x1d9] sm:$0xf] %vm839_vm3, %v912_v13  ;;  %v1565_v19 = vld [vmem:[#allocation3 + $0x70] sm:$0xff]  ;;  %v1161_v49 = vpack.c.bf16 %v3101_v43, %v3100_v42  ;;  %v3104_v50 = vld [vmem:[#allocation2 + $0x240] ss:$8 sps:$4 sm:$0xff]   ;;  %v1344_v55 = vpack.c.bf16 %v3069_v39, %v3068_v45 }
 0x128   : > { %2999 = vmatprep.mubr.msk.bf16.mxu0 %vm1032_vm4, %v1565_v19  ;;  %1229 = vrot.lane.b32.xlu0 %v1218_v16, %s3221_s24  ;;  %v3103_v46 = vld [vmem:[#allocation2 + $0x230] ss:$8 sps:$4 sm:$0xff]   ;;  %1034 = vst.msk [vmem:[#allocation3 + $0x28] sm:$0xff] %vm1032_vm4, %v1029_v41  ;;  %v3121_v5 = vld [vmem:[#allocation2 + $0x220] ss:$8 sps:$4 sm:$0xff]  }
 0x129   : > { %v3073_v51 = vld [vmem:[#allocation2 + $0x109] ss:$8 sps:$4 sm:$0xff]   ;;  %v3110_v52 = vld [vmem:[#allocation2 + $0x259] ss:$8 sps:$4 sm:$0xff]   ;;  %1165 = vst.msk [vmem:[#allocation3 + $0x58] sm:$0xff] %vm1032_vm4, %v1161_v49  ;;  %v1030_v54 = vpack.c.bf16 %v3104_v50, %v3103_v46 }
 0x12a   : > { %v3060_v22 = vld [vmem:[#allocation2 + $0x1b9] ss:$8 sps:$4 sm:$0xff]   ;;  %v3114_v58 = vld [vmem:[#allocation2 + $0x1e8] ss:$8 sps:$4 sm:$0xff]  }
 0x12b   : > { %v3052_v24 = vld [vmem:[#allocation2 + $0x261] ss:$8 sps:$4 sm:$0xff]   ;;  %1035 = vst.msk [vmem:[#allocation3 + $0x50] sm:$0xff] %vm1032_vm4, %v1030_v54  ;;  %v3075_v2 = vld [vmem:[#allocation2 + $0x131] ss:$8 sps:$4 sm:$0xff]  }
 0x12c   : > { %v3061_v27 = vld [vmem:[#allocation2 + $0x1c9] ss:$8 sps:$4 sm:$0xff]   ;;  %1479 = vrot.lane.b32.xlu0 %v1471_v25, %s3221_s24  ;;  %v3072_v56 = vld [vmem:[#allocation2 + $0xf9] ss:$8 sps:$4 sm:$0xff]  }
 0x12d   : > { %v3053_v28 = vld [vmem:[#allocation2 + $0x271] ss:$8 sps:$4 sm:$0xff]   ;;  %v1089_v29 = vpack.c.bf16 %v3061_v27, %v3060_v22  ;;  %v3070_v48 = vld [vmem:[#allocation2 + $0x1c1] ss:$8 sps:$4 sm:$0xff]   ;;  %v1345_v1 = vpack.c.bf16 %v3073_v51, %v3072_v56 }
 0x12e   : > { %v1546_v36 = vpack.c.bf16 %v3053_v28, %v3052_v24  ;;  %v3071_v40 = vld [vmem:[#allocation2 + $0x1d1] ss:$8 sps:$4 sm:$0xff]   ;;  %v3074_v6 = vld [vmem:[#allocation2 + $0x121] ss:$8 sps:$4 sm:$0xff]  }
 0x12f   : > { %1100 = vrot.lane.b32.xlu1 %v1089_v29, %s3221_s24  ;;  %v3111_v53 = vld [vmem:[#allocation2 + $0x269] ss:$8 sps:$4 sm:$0xff]   ;;  %v3115_v59 = vld [vmem:[#allocation2 + $0x1f8] ss:$8 sps:$4 sm:$0xff]   ;;  %v1474_v60 = vpack.c.bf16 %v3071_v40, %v3070_v48  ;;  %v1346_v10 = vpack.c.bf16 %v3075_v2, %v3074_v6 }
 0x130   : > { %1481 = vrot.lane.b32.xlu0 %v1472_v33, %s3221_s24  ;;  %1550 = vst.msk [vmem:[#allocation3 + $0x98] sm:$0xff] %vm1032_vm4, %v1546_v36  ;;  %v1162_v57 = vpack.c.bf16 %v3111_v53, %v3110_v52  ;;  %v1415_v62 = vpack.c.bf16 %v3115_v59, %v3114_v58  ;;  %v3116_v63 = vld [vmem:[#allocation2 + $0x258] ss:$8 sps:$4 sm:$0xff]   ;;  %v3117_v0 = vld [vmem:[#allocation2 + $0x268] ss:$8 sps:$4 sm:$0xff]  }
 0x131   : > { %v1031_v3 = vpack.c.bf16 %v3117_v0, %v3116_v63  ;;  %v3120_v4 = vld [vmem:[#allocation2 + $0x210] ss:$8 sps:$4 sm:$0xff]   ;;  %v3129_v15 = vld [vmem:[#allocation2 + $0x41] ss:$8 sps:$4 sm:$0xff]  }
 0x132   : > { %1166 = vst.msk [vmem:[#allocation3 + $0x80] sm:$0xff] %vm1032_vm4, %v1162_v57  ;;  %1419 = vst.msk [vmem:[#allocation3 + $0x18] sm:$0xff] %vm1032_vm4, %v1415_v62  ;;  %v3122_v7 = vld [vmem:[#allocation2 + $0x9] ss:$8 sps:$4 sm:$0xff]   ;;  %v3123_v8 = vld [vmem:[#allocation2 + $0x19] ss:$8 sps:$4 sm:$0xff]   ;;  %v1416_v9 = vpack.c.bf16 %v3121_v5, %v3120_v4 }
 0x133   : > { %1351 = vrot.lane.b32.xlu1 %v1343_v44, %s3221_s24  ;;  %1036 = vst.msk [vmem:[#allocation3 + $0x78] sm:$0xff] %vm1032_vm4, %v1031_v3  ;;  %v1287_v11 = vpack.c.bf16 %v3123_v8, %v3122_v7  ;;  %v3126_v32 = vld [vmem:[#allocation2 + $0x238] ss:$8 sps:$4 sm:$0xff]   ;;  %v3127_v12 = vld [vmem:[#allocation2 + $0x248] ss:$8 sps:$4 sm:$0xff]  }
 0x134   : > { %1483 = vrot.lane.b32.xlu0 %v1473_v47, %s3221_s24  ;;  %1420 = vst.msk [vmem:[#allocation3 + $0x40] sm:$0xff] %vm1032_vm4, %v1416_v9  ;;  %v1417_v13 = vpack.c.bf16 %v3127_v12, %v3126_v32  ;;  %v3128_v14 = vld [vmem:[#allocation2 + $0x31] ss:$8 sps:$4 sm:$0xff]   ;;  %v3132_v17 = vld [vmem:[#allocation2 + $0x260] ss:$8 sps:$4 sm:$0xff]  }
 0x135   : > { %1291 = vst.msk [vmem:[#allocation3 + $0x10] sm:$0xff] %vm1032_vm4, %v1287_v11  ;;  %v1288_v16 = vpack.c.bf16 %v3129_v15, %v3128_v14  ;;  %v3133_v18 = vld [vmem:[#allocation2 + $0x270] ss:$8 sps:$4 sm:$0xff]   ;;  %v3138_v23 = vld [vmem:[#allocation2 + $0x81] ss:$8 sps:$4 sm:$0xff]  }
 0x136   : > { %1421 = vst.msk [vmem:[#allocation3 + $0x68] sm:$0xff] %vm1032_vm4, %v1417_v13  ;;  %v1418_v19 = vpack.c.bf16 %v3133_v18, %v3132_v17  ;;  %v3134_v20 = vld [vmem:[#allocation2 + $0x59] ss:$8 sps:$4 sm:$0xff]   ;;  %v3135_v21 = vld [vmem:[#allocation2 + $0x69] ss:$8 sps:$4 sm:$0xff]  }
 0x137   : > { %1353 = vrot.lane.b32.xlu1 %v1344_v55, %s3221_s24  ;;  %v1570_v61 = vld [vmem:[#allocation3 + $0x98] sm:$0xff]  ;;  %1292 = vst.msk [vmem:[#allocation3 + $0x38] sm:$0xff] %vm1032_vm4, %v1288_v16  ;;  %v1289_v22 = vpack.c.bf16 %v3135_v21, %v3134_v20  ;;  %v3105_v29 = vld [vmem:[%s3771_s3 + $0x80] sm:$0xff]   ;;  %v3107_v34 = vld [vmem:[%s3771_s3 + $0x88] sm:$0xff]  }
 0x138   : > { %3000 = vmatmul.mubr.msk.bf16.gmra.mrb[36].mxu0 %vm1032_vm4, %v1570_v61  ;;  %1485 = vrot.lane.b32.xlu0 %v1474_v60, %s3221_s24  ;;  %1422 = vst.msk [vmem:[#allocation3 + $0x90] sm:$0xff] %vm1032_vm4, %v1418_v19  ;;  %v3139_v24 = vld [vmem:[#allocation2 + $0x91] ss:$8 sps:$4 sm:$0xff]   ;;  %v3118_v41 = vld [vmem:[%s3771_s3 + $0xe0] sm:$0xff]   ;;  %v3124_v44 = vld [vmem:[%s3771_s3 + $0xe8] sm:$0xff]  }
 0x139   : > { %1293 = vst.msk [vmem:[#allocation3 + $0x60] sm:$0xff] %vm1032_vm4, %v1289_v22  ;;  %v1290_v25 = vpack.c.bf16 %v3139_v24, %v3138_v23  ;;  %v3109_v36 = vld [vmem:[%s3771_s3 + $0x90] sm:$0xff]   ;;  %v3113_v40 = vld [vmem:[%s3771_s3 + $0x98] sm:$0xff]   ;;  %v3119_v42 = vld [vmem:[%s3771_s3 + $0xa0] sm:$0xff]  }
 0x13a   : > { %v3125_v46 = vld [vmem:[%s3771_s3 + $0xa8] sm:$0xff]   ;;  %v3130_v47 = vld [vmem:[%s3771_s3 + $0xf0] sm:$0xff]   ;;  %v3136_v50 = vld [vmem:[%s3771_s3 + $0xf8] sm:$0xff]  }
 0x13b   : > { %1355 = vrot.lane.b32.xlu1 %v1345_v1, %s3221_s24  ;;  %1294 = vst.msk [vmem:[#allocation3 + $0x88] sm:$0xff] %vm1032_vm4, %v1290_v25  ;;  %v3131_v48 = vld [vmem:[%s3771_s3 + $0xb0] sm:$0xff]   ;;  %v3137_v52 = vld [vmem:[%s3771_s3 + $0xb8] sm:$0xff]   ;;  %v3140_v13 = vld [vmem:[%s3773_s5] ss:$8 sps:$4 sm:$0xff]  }
 0x13c   : > { %v3142_v14 = vld [vmem:[%s3773_s5 + $0x4] ss:$8 sps:$4 sm:$0xff]   ;;  %v3145_v15 = vld [vmem:[%s3773_s5 + $0x14] ss:$8 sps:$4 sm:$0xff]   ;;  %v3143_v16 = vld [vmem:[%s3773_s5 + $0x10] ss:$8 sps:$4 sm:$0xff]  }
 0x13d   : > { %v3148_v17 = vld [vmem:[%s3773_s5 + $0x24] ss:$8 sps:$4 sm:$0xff]   ;;  %v3146_v18 = vld [vmem:[%s3773_s5 + $0x20] ss:$8 sps:$4 sm:$0xff]   ;;  %v3149_v19 = vld [vmem:[%s3773_s5 + $0x30] ss:$8 sps:$4 sm:$0xff]  }
 0x13e   : > { %v3151_v20 = vld [vmem:[%s3773_s5 + $0x34] ss:$8 sps:$4 sm:$0xff]   ;;  %v3154_v21 = vld [vmem:[%s3773_s5 + $0x44] ss:$8 sps:$4 sm:$0xff]   ;;  %v3152_v22 = vld [vmem:[%s3773_s5 + $0x40] ss:$8 sps:$4 sm:$0xff]  }
 0x13f   : > { %1357 = vrot.lane.b32.xlu1 %v1346_v10, %s3221_s24 }
 0x16b   : > { %v1224_v26 = vpop.permute.xlu0 %1223 }
 0x16c   : > { %1235 = vst.msk [vmem:[#allocation3 + $0x8] sm:$0xff] %vm1106_vm5, %v1224_v26  ;;  %v3155_v26 = vld [vmem:[%s3773_s5 + $0x50] ss:$8 sps:$4 sm:$0xff]  }
 0x171   : > { %v1095_v28 = vpop.permute.xlu0 %1094 }
 0x172   : > { %1107 = vst.msk [vmem:[#allocation3] sm:$0xff] %vm1106_vm5, %v1095_v28 }
 0x173   : > { %v1552_v27 = vld [vmem:[#allocation3 + $0x8] sm:$0xff] }
 0x174   : > { %1910 = vmatprep.mubr.bf16.mxu1 %v1552_v27  ;;  %v3157_v27 = vld [vmem:[%s3773_s5 + $0x54] ss:$8 sps:$4 sm:$0xff]  }
 0x179   : > { %v1551_v33 = vld [vmem:[#allocation3] sm:$0xff] }
 0x17a   : > { %1911 = vmatmul.mubr.bf16.vlgmr.msra.gmra.mrb[0].mxu1 %v1551_v33  ;;  %v3163_v33 = vld [vmem:[%s3773_s5 + $0x74] ss:$8 sps:$4 sm:$0xff]  }
 0x17b   : > { %v1226_v30 = vpop.permute.xlu1 %1225  ;;  %2864 = vmatpush3.bf16.msra.mxu1 %v3105_v29  ;;  %v3158_v29 = vld [vmem:[%s3773_s5 + $0x60] ss:$8 sps:$4 sm:$0xff]  }
 0x17c   : > { %1236 = vst.msk [vmem:[#allocation3 + $0x30] sm:$0xff] %vm1106_vm5, %v1226_v30  ;;  %2865 = vmatprep.subr.bf16.mxu1 %v3106_v31  ;;  %v3160_v30 = vld [vmem:[%s3773_s5 + $0x64] ss:$8 sps:$4 sm:$0xff]   ;;  %v3161_v31 = vld [vmem:[%s3773_s5 + $0x70] ss:$8 sps:$4 sm:$0xff]  }
 0x17f   : > { %2866 = vmatpush3.bf16.msra.mxu1 %v3107_v34  ;;  %v3222_v34 = vmov 0  }
 0x180   : > { %2867 = vmatprep.subr.bf16.mxu1 %v3108_v35  ;;  %v3164_v35 = vld [vmem:[%s3775_s7 + $0x40] sm:$0xff]  }
 0x181   : > { %v1097_v39 = vpop.permute.xlu1 %1096  ;;  %2911 = vmatprep.subr.bf16.mxu0 %v3164_v35 }
 0x182   : > { %1108 = vst.msk [vmem:[#allocation3 + $0x28] sm:$0xff] %vm1106_vm5, %v1097_v39  ;;  %v3168_v39 = vld [vmem:[%s3775_s7 + $0x50] sm:$0xff]  }
 0x183   : > { %v1557_v37 = vld [vmem:[#allocation3 + $0x30] sm:$0xff]  ;;  %2868 = vmatpush3.bf16.msra.mxu1 %v3109_v36  ;;  %v3165_v36 = vld [vmem:[%s3775_s7] sm:$0xff]  }
 0x184   : > { %1918 = vmatprep.mubr.bf16.mxu1 %v1557_v37  ;;  %2869 = vmatprep.subr.bf16.mxu1 %v3112_v38  ;;  %v3166_v37 = vld [vmem:[%s3775_s7 + $0x48] sm:$0xff]  }
 0x185   : > { %2912 = vmatpush3.bf16.msra.mxu0 %v3165_v36  ;;  %v3167_v38 = vld [vmem:[%s3775_s7 + $0x8] sm:$0xff]  }
 0x186   : > { %2913 = vmatprep.subr.bf16.mxu0 %v3166_v37 }
 0x187   : > { %2870 = vmatpush3.bf16.msra.mxu1 %v3113_v40  ;;  %v3169_v40 = vld [vmem:[%s3775_s7 + $0x10] sm:$0xff]  }
 0x188   : > { %2871 = vmatprep.subr.bf16.mxu1 %v3118_v41  ;;  %v3170_v41 = vld [vmem:[%s3775_s7 + $0x58] sm:$0xff]  }
 0x189   : > { %v1556_v45 = vld [vmem:[#allocation3 + $0x28] sm:$0xff]  ;;  %2914 = vmatpush3.bf16.msra.mxu0 %v3167_v38 }
 0x18a   : > { %1919 = vmatmul.mubr.bf16.gmra.mrb[4].mxu1 %v1556_v45  ;;  %2915 = vmatprep.subr.bf16.mxu0 %v3168_v39  ;;  %v3174_v45 = vld [vmem:[%s3775_s7 + $0x68] sm:$0xff]  }
 0x18b   : > { %v1228_v43 = vpop.permute.xlu0 %1227  ;;  %2872 = vmatpush3.bf16.msra.mxu1 %v3119_v42  ;;  %v3171_v42 = vld [vmem:[%s3775_s7 + $0x18] sm:$0xff]  }
 0x18c   : > { %1237 = vst.msk [vmem:[#allocation3 + $0x58] sm:$0xff] %vm1106_vm5, %v1228_v43  ;;  %2873 = vmatprep.subr.bf16.mxu1 %v3124_v44  ;;  %v3172_v43 = vld [vmem:[%s3775_s7 + $0x60] sm:$0xff]  }
 0x18d   : > { %2916 = vmatpush3.bf16.msra.mxu0 %v3169_v40  ;;  %v3173_v44 = vld [vmem:[%s3775_s7 + $0x20] sm:$0xff]  }
 0x18e   : > { %2917 = vmatprep.subr.bf16.mxu0 %v3170_v41 }
 0x18f   : > { %2874 = vmatpush3.bf16.msra.mxu1 %v3125_v46 }
 0x190   : > { %2875 = vmatprep.subr.bf16.mxu1 %v3130_v47 }
 0x191   : > { %v1099_v51 = vpop.permute.xlu1 %1098  ;;  %2918 = vmatpush3.bf16.msra.mxu0 %v3171_v42 }
 0x192   : > { %1109 = vst.msk [vmem:[#allocation3 + $0x50] sm:$0xff] %vm1106_vm5, %v1099_v51  ;;  %2919 = vmatprep.subr.bf16.mxu0 %v3172_v43 }
 0x193   : > { %v1562_v49 = vld [vmem:[#allocation3 + $0x58] sm:$0xff]  ;;  %2876 = vmatpush3.bf16.msra.mxu1 %v3131_v48 }
 0x194   : > { %1926 = vmatprep.mubr.bf16.mxu1 %v1562_v49  ;;  %2877 = vmatprep.subr.bf16.mxu1 %v3136_v50 }
 0x195   : > { %2920 = vmatpush3.bf16.msra.mxu0 %v3173_v44 }
 0x196   : > { %2921 = vmatprep.subr.bf16.mxu0 %v3174_v45 }
 0x197   : > { %2878 = vmatpush3.bf16.msra.mxu1 %v3137_v52 }
 0x198   : > { %2193 = vmatprep.subr.bf16.mxu1 %v3142_v14 }
 0x199   : > { %v1561_v54 = vld [vmem:[#allocation3 + $0x50] sm:$0xff] }
 0x19a   : > { %v1230_v53 = vpop.permute.xlu0 %1229  ;;  %1927 = vmatmul.mubr.bf16.gmra.mrb[8].mxu1 %v1561_v54 }
 0x19b   : > { %1238 = vst.msk [vmem:[#allocation3 + $0x80] sm:$0xff] %vm1106_vm5, %v1230_v53 }
 0x19e   : > { %v1480_v55 = vpop.permute.xlu0 %1479 }
 0x19f   : > { %1491 = vst.msk [vmem:[#allocation3 + $0x18] sm:$0xff] %vm1106_vm5, %v1480_v55 }
 0x1a1   : > { %v1101_v56 = vpop.permute.xlu1 %1100 }
 0x1a2   : > { %1110 = vst.msk [vmem:[#allocation3 + $0x78] sm:$0xff] %vm1106_vm5, %v1101_v56  ;;  %v1482_v57 = vpop.permute.xlu0 %1481  ;;  %v1567_v58 = vld [vmem:[#allocation3 + $0x80] sm:$0xff] }
 0x1a3   : > { %1492 = vst.msk [vmem:[#allocation3 + $0x40] sm:$0xff] %vm1106_vm5, %v1482_v57  ;;  %1934 = vmatprep.mubr.bf16.mxu1 %v1567_v58 }
 0x1a5   : > { %v1352_v59 = vpop.permute.xlu1 %1351 }
 0x1a6   : > { %1363 = vst.msk [vmem:[#allocation3 + $0x10] sm:$0xff] %vm1106_vm5, %v1352_v59  ;;  %v1484_v60 = vpop.permute.xlu0 %1483  ;;  %v1554_v0 = vld [vmem:[#allocation3 + $0x18] sm:$0xff] }
 0x1a7   : > { %1493 = vst.msk [vmem:[#allocation3 + $0x68] sm:$0xff] %vm1106_vm5, %v1484_v60 }
 0x1a9   : > { %v1354_v61 = vpop.permute.xlu1 %1353  ;;  %v1566_v62 = vld [vmem:[#allocation3 + $0x78] sm:$0xff] }
 0x1aa   : > { %1364 = vst.msk [vmem:[#allocation3 + $0x38] sm:$0xff] %vm1106_vm5, %v1354_v61  ;;  %1935 = vmatmul.mubr.bf16.gmra.mrb[12].mxu1 %v1566_v62  ;;  %v1486_v63 = vpop.permute.xlu0 %1485  ;;  %v1559_v4 = vld [vmem:[#allocation3 + $0x40] sm:$0xff] }
 0x1ab   : > { %1494 = vst.msk [vmem:[#allocation3 + $0x90] sm:$0xff] %vm1106_vm5, %v1486_v63  ;;  %1975 = vmatprep.mubr.bf16.mxu1 %v1554_v0 }
 0x1ad   : > { %v1356_v1 = vpop.permute.xlu1 %1355  ;;  %v1553_v3 = vld [vmem:[#allocation3 + $0x10] sm:$0xff] }
 0x1ae   : > { %1365 = vst.msk [vmem:[#allocation3 + $0x60] sm:$0xff] %vm1106_vm5, %v1356_v1  ;;  %v1564_v6 = vld [vmem:[#allocation3 + $0x68] sm:$0xff] }
 0x1b1   : > { %v1358_v2 = vpop.permute.xlu1 %1357  ;;  %v1558_v5 = vld [vmem:[#allocation3 + $0x38] sm:$0xff] }
 0x1b2   : > { %1366 = vst.msk [vmem:[#allocation3 + $0x88] sm:$0xff] %vm1106_vm5, %v1358_v2  ;;  %1976 = vmatmul.mubr.bf16.vlgmr.msra.gmra.mrb[16].mxu1 %v1553_v3  ;;  %v1569_v8 = vld [vmem:[#allocation3 + $0x90] sm:$0xff] }
 0x1b3   : > { %1983 = vmatprep.mubr.bf16.mxu1 %v1559_v4  ;;  %2194 = vmatpush1.bf16.msra.mxu1 %v3140_v13 }
 0x1b4   : > { %2195 = vmatprep.subr.bf16.mxu1 %v3145_v15 }
 0x1b5   : > { %v1563_v7 = vld [vmem:[#allocation3 + $0x60] sm:$0xff] }
 0x1b7   : > { %2196 = vmatpush1.bf16.msra.mxu1 %v3143_v16 }
 0x1b8   : > { %2197 = vmatprep.subr.bf16.mxu1 %v3148_v17 }
 0x1b9   : > { %v1568_v9 = vld [vmem:[#allocation3 + $0x88] sm:$0xff] }
 0x1ba   : > { %1984 = vmatmul.mubr.bf16.gmra.mrb[20].mxu1 %v1558_v5 }
 0x1bb   : > { %1991 = vmatprep.mubr.bf16.mxu1 %v1564_v6  ;;  %2198 = vmatpush1.bf16.msra.mxu1 %v3146_v18  ;;  %v2681_v6 = vld [vmem:[%s3772_s4] ss:$0 sm:$0xff] }
 0x1bc   : > { %2199 = vmatprep.subr.bf16.mxu1 %v3151_v20 }
 0x1bf   : > { %2200 = vmatpush1.bf16.msra.mxu1 %v3149_v19 }
 0x1c0   : > { %2201 = vmatprep.subr.bf16.mxu1 %v3154_v21 }
 0x1c2   : > { %1992 = vmatmul.mubr.bf16.gmra.mrb[24].mxu1 %v1563_v7 }
 0x1c3   : > { %1999 = vmatprep.mubr.bf16.mxu1 %v1569_v8  ;;  %2202 = vmatpush1.bf16.msra.mxu1 %v3152_v22 }
 0x1c4   : > { %2203 = vmatprep.subr.bf16.mxu1 %v3157_v27 }
 0x1c7   : > { %2204 = vmatpush1.bf16.msra.mxu1 %v3155_v26 }
 0x1c8   : > { %2205 = vmatprep.subr.bf16.mxu1 %v3160_v30 }
 0x1ca   : > { %2000 = vmatmul.mubr.bf16.gmra.mrb[28].mxu1 %v1568_v9 }
 0x1cb   : > { %2206 = vmatpush1.bf16.msra.mxu1 %v3158_v29  ;;  %2225 = vmatprep.mubr.bf16.mxu1 %v3222_v34 }
 0x1cc   : > { %2207 = vmatprep.subr.bf16.mxu1 %v3163_v33 }
 0x1cf   : > { %2208 = vmatpush1.bf16.msra.mxu1 %v3161_v31 }
 0x1eb   : > { %v3627_v10 = vpop.f32.mrb[32].mxu0 }
 0x1ec   : > { %v3629_v11 = vpop.f32.mrb[33].mxu0 }
 0x1ed   : > { %v3631_v32 = vpop.f32.mrb[34].mxu0 }
 0x1ee   : > { %v3633_v12 = vpop.f32.mrb[35].mxu0 }
 0x20b   : > { %v3665_v23 = vpop.f32.mrb[36].mxu0 }
 0x20c   : > { %v3667_v24 = vpop.f32.mrb[37].mxu0 }
 0x20d   : > { %v3669_v25 = vpop.f32.mrb[38].mxu0 }
 0x20e   : > { %v3677_v28 = vpop.f32.mrb[39].mxu0 }
 0x24d   : > { %v2839_v46 = vpop.f32.mrb[0].mxu1 }
 0x24e   : > { %v2840_v47 = vpop.f32.mrb[1].mxu1 }
 0x24f   : > { %v2841_v48 = vadd.f32 %v2840_v47, %v2839_v46  ;;  %v2842_v49 = vpop.f32.mrb[2].mxu1 }
 0x250   : > { %v2843_v50 = vpop.f32.mrb[3].mxu1 }
 0x251   : > { %v2844_v51 = vadd.f32 %v2843_v50, %v2842_v49  ;;  %v1913_v9 = vadd.f32 %v2841_v48, %v2681_v6 }
 0x253   : > { %v1916_v16 = vadd.f32 %v2844_v51, %v2681_v6 }
 0x25d   : > { %v2845_v52 = vpop.f32.mrb[4].mxu1 }
 0x25e   : > { %v2846_v53 = vpop.f32.mrb[5].mxu1 }
 0x25f   : > { %v2847_v54 = vadd.f32 %v2846_v53, %v2845_v52  ;;  %v2848_v55 = vpop.f32.mrb[6].mxu1 }
 0x260   : > { %v2849_v56 = vpop.f32.mrb[7].mxu1 }
 0x261   : > { %v2850_v57 = vadd.f32 %v2849_v56, %v2848_v55  ;;  %v1921_v27 = vadd.f32 %v2847_v54, %v2681_v6 }
 0x263   : > { %v1924_v36 = vadd.f32 %v2850_v57, %v2681_v6 }
 0x26d   : > { %v2851_v58 = vpop.f32.mrb[8].mxu1 }
 0x26e   : > { %v2852_v59 = vpop.f32.mrb[9].mxu1 }
 0x26f   : > { %v2853_v60 = vadd.f32 %v2852_v59, %v2851_v58  ;;  %v2854_v61 = vpop.f32.mrb[10].mxu1 }
 0x270   : > { %v2855_v62 = vpop.f32.mrb[11].mxu1 }
 0x271   : > { %v2856_v63 = vadd.f32 %v2855_v62, %v2854_v61  ;;  %v1929_v43 = vadd.f32 %v2853_v60, %v2681_v6 }
 0x273   : > { %v1932_v49 = vadd.f32 %v2856_v63, %v2681_v6 }
 0x27d   : > { %v2857_v0 = vpop.f32.mrb[12].mxu1 }
 0x27e   : > { %v2858_v1 = vpop.f32.mrb[13].mxu1 }
 0x27f   : > { %v2859_v2 = vadd.f32 %v2858_v1, %v2857_v0  ;;  %v2860_v3 = vpop.f32.mrb[14].mxu1 }
 0x280   : > { %v2861_v4 = vpop.f32.mrb[15].mxu1 }
 0x281   : > { %v2862_v5 = vadd.f32 %v2861_v4, %v2860_v3  ;;  %v1937_v56 = vadd.f32 %v2859_v2, %v2681_v6 }
 0x283   : > { %v1940_v62 = vadd.f32 %v2862_v5, %v2681_v6  ;;  %v3176_v5 = vld [vmem:[%s3775_s7 + $0x70] sm:$0xff]   ;;  %v2103_v6 = vlaneseq }
 0x285   : > { %v2879_v7 = vpop.f32.mrb[16].mxu1 }
 0x286   : > { %v2880_v8 = vpop.f32.mrb[17].mxu1 }
 0x287   : > { %v2881_v13 = vadd.f32 %v2880_v8, %v2879_v7  ;;  %v2882_v14 = vpop.f32.mrb[18].mxu1  ;;  %v3175_v8 = vld [vmem:[%s3775_s7 + $0x28] sm:$0xff]  }
 0x288   : > { %v2883_v15 = vpop.f32.mrb[19].mxu1  ;;  %2922 = vmatpush3.bf16.msra.mxu0 %v3175_v8 }
 0x289   : > { %v1978_v17 = vadd.f32 %v2881_v13, %v1913_v9  ;;  %v2884_v18 = vadd.f32 %v2883_v15, %v2882_v14  ;;  %2923 = vmatprep.subr.bf16.mxu0 %v3176_v5  ;;  %v2104_v9 = vshrl.u32 %v2103_v6, 7  ;;  %v2101_v14 = vld [vmem:[%s3774_s6] sm:$0x3] }
 0x28a   : > { %v2738_v6 = vld [vmem:[%s3776_s8] ss:$0 sm:$0xff] }
 0x28b   : > { %v2043_v19 = vadd.f32 %v3629_v11, %v1978_v17  ;;  %v1981_v20 = vadd.f32 %v2884_v18, %v1916_v16  ;;  %v2105_v13 = vsub.s32 0, %v2104_v9  ;;  %v2109_v15 = vsub.s32 1, %v2104_v9 }
 0x28d   : > { %v2046_v21 = vadd.f32 %v3633_v12, %v1981_v20  ;;  %v2885_v22 = vpop.f32.mrb[20].mxu1  ;;  %v2073_v29 = vmax.f32 %v2043_v19, 0.0  ;;  %v2106_v16 = vrot.slane %v2101_v14, %v2105_v13  ;;  %v2110_v17 = vrot.slane %v2101_v14, %v2109_v15 }
 0x28e   : > { %v2886_v26 = vpop.f32.mrb[21].mxu1 }
 0x28f   : > { %v2074_v30 = vmax.f32 %v2046_v21, 0.0  ;;  %v2887_v31 = vadd.f32 %v2886_v26, %v2885_v22  ;;  %v2888_v33 = vpop.f32.mrb[22].mxu1 }
 0x290   : > { %v2889_v35 = vpop.f32.mrb[23].mxu1 }
 0x291   : > { %v2081_v37 = vpack.c.bf16 %v2074_v30, %v2073_v29  ;;  %v1986_v38 = vadd.f32 %v2887_v31, %v1921_v27  ;;  %v2890_v39 = vadd.f32 %v2889_v35, %v2888_v33 }
 0x293   : > { %v2051_v40 = vadd.f32 %v3627_v10, %v1986_v38  ;;  %v1989_v41 = vadd.f32 %v2890_v39, %v1924_v36  ;;  %2226 = vmatmul.mubr.bf16.vlgmr.msra.gmra.mrb[32].mxu1 %v2081_v37 }
 0x294   : > { %2235 = vmatprep.mubr.bf16.mxu1 %v3222_v34 }
 0x295   : > { %v2054_v11 = vadd.f32 %v3631_v32, %v1989_v41  ;;  %v2891_v12 = vpop.f32.mrb[24].mxu1  ;;  %v2075_v44 = vmax.f32 %v2051_v40, 0.0 }
 0x296   : > { %v2892_v42 = vpop.f32.mrb[25].mxu1 }
 0x297   : > { %v2076_v45 = vmax.f32 %v2054_v11, 0.0  ;;  %v2893_v46 = vadd.f32 %v2892_v42, %v2891_v12  ;;  %v2894_v47 = vpop.f32.mrb[26].mxu1 }
 0x298   : > { %v2895_v48 = vpop.f32.mrb[27].mxu1 }
 0x299   : > { %v1994_v50 = vadd.f32 %v2893_v46, %v1929_v43  ;;  %v2896_v51 = vadd.f32 %v2895_v48, %v2894_v47  ;;  %v2082_v52 = vpack.c.bf16 %v2076_v45, %v2075_v44 }
 0x29b   : > { %v2059_v10 = vadd.f32 %v3667_v24, %v1994_v50  ;;  %v1997_v53 = vadd.f32 %v2896_v51, %v1932_v49  ;;  %2236 = vmatmul.mubr.bf16.gmra.mrb[36].mxu1 %v2082_v52 }
 0x29c   : > { %2245 = vmatprep.mubr.bf16.mxu1 %v3222_v34 }
 0x29d   : > { %v2062_v32 = vadd.f32 %v3677_v28, %v1997_v53  ;;  %v2897_v54 = vpop.f32.mrb[28].mxu1  ;;  %v2077_v57 = vmax.f32 %v2059_v10, 0.0 }
 0x29e   : > { %v2898_v55 = vpop.f32.mrb[29].mxu1 }
 0x29f   : > { %v2078_v58 = vmax.f32 %v2062_v32, 0.0  ;;  %v2899_v59 = vadd.f32 %v2898_v55, %v2897_v54  ;;  %v2900_v60 = vpop.f32.mrb[30].mxu1 }
 0x2a0   : > { %v2901_v61 = vpop.f32.mrb[31].mxu1 }
 0x2a1   : > { %v2002_v63 = vadd.f32 %v2899_v59, %v1937_v56  ;;  %v2902_v0 = vadd.f32 %v2901_v61, %v2900_v60  ;;  %v2083_v1 = vpack.c.bf16 %v2078_v58, %v2077_v57 }
 0x2a3   : > { %v2067_v24 = vadd.f32 %v3665_v23, %v2002_v63  ;;  %v2005_v3 = vadd.f32 %v2902_v0, %v1940_v62  ;;  %2246 = vmatmul.mubr.bf16.gmra.mrb[40].mxu1 %v2083_v1  ;;  %v3177_v23 = vld [vmem:[%s3775_s7 + $0x30] sm:$0xff]  }
 0x2a4   : > { %2255 = vmatprep.mubr.bf16.mxu1 %v3222_v34  ;;  %2924 = vmatpush3.bf16.msra.mxu0 %v3177_v23  ;;  %v3179_v34 = vld [vmem:[%s3775_s7 + $0x38] sm:$0xff]  }
 0x2a5   : > { %v2070_v28 = vadd.f32 %v3669_v25, %v2005_v3  ;;  %v2079_v4 = vmax.f32 %v2067_v24, 0.0  ;;  %v3178_v25 = vld [vmem:[%s3775_s7 + $0x78] sm:$0xff]  }
 0x2a6   : > { %2925 = vmatprep.subr.bf16.mxu0 %v3178_v25 }
 0x2a7   : > { %v2080_v7 = vmax.f32 %v2070_v28, 0.0 }
 0x2a8   : > { %2926 = vmatpush3.bf16.msra.mxu0 %v3179_v34 }
 0x2a9   : > { %v2084_v2 = vpack.c.bf16 %v2080_v7, %v2079_v4 }
 0x2ab   : > { %2256 = vmatmul.mubr.bf16.gmra.mrb[44].mxu1 %v2084_v2 }
 0x366   : > { %v2227_v18 = vpop.f32.mrb[32].mxu1 }
 0x367   : > { %v2228_v19 = vadd.f32 %v2227_v18, %v2106_v16  ;;  %v2229_v20 = vpop.f32.mrb[33].mxu1 }
 0x368   : > { %v2230_v21 = vadd.f32 %v2229_v20, %v2110_v17  ;;  %v2231_v22 = vpop.f32.mrb[34].mxu1 }
 0x369   : > { %v2232_v26 = vadd.f32 %v2231_v22, %v2106_v16  ;;  %v2233_v27 = vpop.f32.mrb[35].mxu1  ;;  %v2266_v30 = vmax.f32 %v2228_v19, 0.0 }
 0x36a   : > { %v2234_v29 = vadd.f32 %v2233_v27, %v2110_v17  ;;  %v2267_v33 = vmax.f32 %v2230_v21, 0.0 }
 0x36b   : > { %v2268_v31 = vmax.f32 %v2232_v26, 0.0 }
 0x36c   : > { %v2269_v35 = vmax.f32 %v2234_v29, 0.0 }
 0x36d   : > { %v2282_v36 = vpack.c.bf16 %v2268_v31, %v2266_v30 }
 0x36e   : > { %v2283_v37 = vpack.c.bf16 %v2269_v35, %v2267_v33  ;;  %v2237_v38 = vpop.f32.mrb[36].mxu1 }
 0x36f   : > { %v2238_v39 = vadd.f32 %v2237_v38, %v2106_v16  ;;  %v2239_v40 = vpop.f32.mrb[37].mxu1 }
 0x370   : > { %v2240_v41 = vadd.f32 %v2239_v40, %v2110_v17  ;;  %v2241_v11 = vpop.f32.mrb[38].mxu1  ;;  %2457 = vmatprep.mubr.bf16.mxu0 %v2283_v37 }
 0x371   : > { %v2242_v12 = vadd.f32 %v2241_v11, %v2106_v16  ;;  %v2243_v42 = vpop.f32.mrb[39].mxu1  ;;  %2458 = vmatmul.mubr.bf16.vlgmr.msra.gmra.mrb[40].mxu0 %v2282_v36  ;;  %v2270_v44 = vmax.f32 %v2238_v39, 0.0 }
 0x372   : > { %v2244_v43 = vadd.f32 %v2243_v42, %v2110_v17  ;;  %v2271_v46 = vmax.f32 %v2240_v41, 0.0 }
 0x373   : > { %v2272_v45 = vmax.f32 %v2242_v12, 0.0 }
 0x374   : > { %v2273_v47 = vmax.f32 %v2244_v43, 0.0 }
 0x375   : > { %v2284_v48 = vpack.c.bf16 %v2272_v45, %v2270_v44 }
 0x376   : > { %v2285_v49 = vpack.c.bf16 %v2273_v47, %v2271_v46  ;;  %v2247_v50 = vpop.f32.mrb[40].mxu1 }
 0x377   : > { %v2248_v51 = vadd.f32 %v2247_v50, %v2106_v16  ;;  %v2249_v52 = vpop.f32.mrb[41].mxu1 }
 0x378   : > { %v2250_v10 = vadd.f32 %v2249_v52, %v2110_v17  ;;  %v2251_v53 = vpop.f32.mrb[42].mxu1  ;;  %2465 = vmatprep.mubr.bf16.mxu0 %v2285_v49 }
 0x379   : > { %v2252_v32 = vadd.f32 %v2251_v53, %v2106_v16  ;;  %v2253_v54 = vpop.f32.mrb[43].mxu1  ;;  %2466 = vmatmul.mubr.bf16.gmra.mrb[44].mxu0 %v2284_v48  ;;  %v2274_v56 = vmax.f32 %v2248_v51, 0.0 }
 0x37a   : > { %v2254_v55 = vadd.f32 %v2253_v54, %v2110_v17  ;;  %v2275_v58 = vmax.f32 %v2250_v10, 0.0 }
 0x37b   : > { %v2276_v57 = vmax.f32 %v2252_v32, 0.0 }
 0x37c   : > { %v2277_v59 = vmax.f32 %v2254_v55, 0.0 }
 0x37d   : > { %v2286_v60 = vpack.c.bf16 %v2276_v57, %v2274_v56 }
 0x37e   : > { %v2287_v61 = vpack.c.bf16 %v2277_v59, %v2275_v58  ;;  %v2257_v62 = vpop.f32.mrb[44].mxu1 }
 0x37f   : > { %v2258_v63 = vadd.f32 %v2257_v62, %v2106_v16  ;;  %v2259_v0 = vpop.f32.mrb[45].mxu1 }
 0x380   : > { %v2260_v1 = vadd.f32 %v2259_v0, %v2110_v17  ;;  %v2261_v24 = vpop.f32.mrb[46].mxu1  ;;  %2473 = vmatprep.mubr.bf16.mxu0 %v2287_v61 }
 0x381   : > { %v2262_v3 = vadd.f32 %v2261_v24, %v2106_v16  ;;  %v2263_v28 = vpop.f32.mrb[47].mxu1  ;;  %2474 = vmatmul.mubr.bf16.gmra.mrb[48].mxu0 %v2286_v60  ;;  %v2278_v7 = vmax.f32 %v2258_v63, 0.0 }
 0x382   : > { %v2264_v4 = vadd.f32 %v2263_v28, %v2110_v17  ;;  %v2279_v8 = vmax.f32 %v2260_v1, 0.0 }
 0x383   : > { %v2280_v2 = vmax.f32 %v2262_v3, 0.0 }
 0x384   : > { %v2281_v5 = vmax.f32 %v2264_v4, 0.0 }
 0x385   : > { %v2288_v23 = vpack.c.bf16 %v2280_v2, %v2278_v7 }
 0x386   : > { %v2289_v25 = vpack.c.bf16 %v2281_v5, %v2279_v8 }
 0x388   : > { %2481 = vmatprep.mubr.bf16.mxu0 %v2289_v25 }
 0x389   : > { %2482 = vmatmul.mubr.bf16.gmra.mrb[52].mxu0 %v2288_v23 }
 0x444   : > { %v2927_v34 = vpop.f32.mrb[40].mxu0 }
 0x445   : > { %v2928_v9 = vpop.f32.mrb[41].mxu0 }
 0x446   : > { %v2929_v13 = vadd.f32 %v2928_v9, %v2927_v34  ;;  %v2930_v14 = vpop.f32.mrb[42].mxu0 }
 0x447   : > { %v2931_v15 = vpop.f32.mrb[43].mxu0 }
 0x448   : > { %v2460_v16 = vadd.f32 %v2929_v13, %v2738_v6  ;;  %v2932_v18 = vadd.f32 %v2931_v15, %v2930_v14 }
 0x44a   : > { %v2755_v17 = vmul.f32 -1.442695, %v2460_v16  ;;  %v2463_v19 = vadd.f32 %v2932_v18, %v2738_v6 }
 0x44c   : > { %3180 = vpow2.f32 %v2755_v17  ;;  %v2756_v20 = vmul.f32 -1.442695, %v2463_v19  ;;  %v2933_v21 = vpop.f32.mrb[44].mxu0 }
 0x44d   : > { %v2934_v22 = vpop.f32.mrb[45].mxu0 }
 0x44e   : > { %3182 = vpow2.f32 %v2756_v20  ;;  %v2935_v26 = vadd.f32 %v2934_v22, %v2933_v21  ;;  %v2936_v27 = vpop.f32.mrb[46].mxu0 }
 0x44f   : > { %v2937_v29 = vpop.f32.mrb[47].mxu0 }
 0x450   : > { %v2468_v30 = vadd.f32 %v2935_v26, %v2738_v6  ;;  %v2938_v31 = vadd.f32 %v2937_v29, %v2936_v27 }
 0x452   : > { %v2757_v33 = vmul.f32 -1.442695, %v2468_v30  ;;  %v2471_v35 = vadd.f32 %v2938_v31, %v2738_v6 }
 0x454   : > { %3184 = vpow2.f32 %v2757_v33  ;;  %v2758_v36 = vmul.f32 -1.442695, %v2471_v35  ;;  %v2939_v37 = vpop.f32.mrb[48].mxu0 }
 0x455   : > { %v2940_v38 = vpop.f32.mrb[49].mxu0 }
 0x456   : > { %v3181_v39 = vpop.eup %3180  ;;  %3186 = vpow2.f32 %v2758_v36  ;;  %v2941_v40 = vadd.f32 %v2940_v38, %v2939_v37  ;;  %v2942_v41 = vpop.f32.mrb[50].mxu0 }
 0x457   : > { %v2514_v11 = vadd.f32 1.0, %v3181_v39  ;;  %v2943_v12 = vpop.f32.mrb[51].mxu0 }
 0x458   : > { %v3183_v42 = vpop.eup %3182  ;;  %v2476_v43 = vadd.f32 %v2941_v40, %v2738_v6  ;;  %v2944_v44 = vadd.f32 %v2943_v12, %v2942_v41 }
 0x459   : > { %v2515_v45 = vadd.f32 1.0, %v3183_v42  ;;  %3188 = vrcp.f32 %v2514_v11 }
 0x45a   : > { %v2759_v46 = vmul.f32 -1.442695, %v2476_v43  ;;  %v2479_v47 = vadd.f32 %v2944_v44, %v2738_v6 }
 0x45b   : > { %3190 = vrcp.f32 %v2515_v45 }
 0x45c   : > { %3192 = vpow2.f32 %v2759_v46  ;;  %v2760_v48 = vmul.f32 -1.442695, %v2479_v47  ;;  %v2945_v49 = vpop.f32.mrb[52].mxu0 }
 0x45d   : > { %v2946_v50 = vpop.f32.mrb[53].mxu0 }
 0x45e   : > { %v3185_v51 = vpop.eup %3184  ;;  %3194 = vpow2.f32 %v2760_v48  ;;  %v2947_v52 = vadd.f32 %v2946_v50, %v2945_v49  ;;  %v2948_v10 = vpop.f32.mrb[54].mxu0 }
 0x45f   : > { %v2516_v53 = vadd.f32 1.0, %v3185_v51  ;;  %v2949_v32 = vpop.f32.mrb[55].mxu0 }
 0x460   : > { %v3187_v54 = vpop.eup %3186  ;;  %v2484_v55 = vadd.f32 %v2947_v52, %v2738_v6  ;;  %v2950_v56 = vadd.f32 %v2949_v32, %v2948_v10 }
 0x461   : > { %v2517_v57 = vadd.f32 1.0, %v3187_v54  ;;  %3196 = vrcp.f32 %v2516_v53 }
 0x462   : > { %v2761_v58 = vmul.f32 -1.442695, %v2484_v55  ;;  %v2487_v59 = vadd.f32 %v2950_v56, %v2738_v6 }
 0x463   : > { %3198 = vrcp.f32 %v2517_v57  ;;  %v3189_v60 = vpop.eup %3188 }
 0x464   : > { %3200 = vpow2.f32 %v2761_v58  ;;  %v2762_v61 = vmul.f32 -1.442695, %v2487_v59 }
 0x465   : > { %v3191_v62 = vpop.eup %3190 }
 0x466   : > { %v3193_v63 = vpop.eup %3192  ;;  %v2785_v0 = vpack.c.bf16 %v3191_v62, %v3189_v60  ;;  %3202 = vpow2.f32 %v2762_v61 }
 0x467   : > { %v2518_v1 = vadd.f32 1.0, %v3193_v63 }
 0x468   : > { %v3195_v24 = vpop.eup %3194  ;;  %2786 = vst [vmem:[%s336_s16] sm:$0xff] %v2785_v0  }
 0x469   : > { %v2519_v3 = vadd.f32 1.0, %v3195_v24  ;;  %3204 = vrcp.f32 %v2518_v1 }
 0x46b   : > { %3206 = vrcp.f32 %v2519_v3  ;;  %v3197_v28 = vpop.eup %3196 }
 0x46d   : > { %v3199_v4 = vpop.eup %3198 }
 0x46e   : > { %v3201_v7 = vpop.eup %3200  ;;  %v2790_v2 = vpack.c.bf16 %v3199_v4, %v3197_v28 }
 0x46f   : > { %v2520_v8 = vadd.f32 1.0, %v3201_v7 }
 0x470   : > { %v3203_v5 = vpop.eup %3202  ;;  %2802 = vst [vmem:[%s336_s16 + $0x8] sm:$0xff] %v2790_v2  }
 0x471   : > { %v2521_v23 = vadd.f32 1.0, %v3203_v5  ;;  %3208 = vrcp.f32 %v2520_v8 }
 0x473   : > { %3210 = vrcp.f32 %v2521_v23  ;;  %v3205_v25 = vpop.eup %3204 }
 0x475   : > { %v3207_v34 = vpop.eup %3206 }
 0x476   : > { %v2795_v6 = vpack.c.bf16 %v3207_v34, %v3205_v25 }
 0x478   : > { %2803 = vst [vmem:[%s336_s16 + $0x10] sm:$0xff] %v2795_v6  }
 0x47b   : > { %v3209_v9 = vpop.eup %3208 }
 0x47d   : > { %v3211_v13 = vpop.eup %3210 }
 0x47e   : > { %v2800_v14 = vpack.c.bf16 %v3211_v13, %v3209_v9 }
 0x480   : > { %2804 = vst [vmem:[%s336_s16 + $0x18] sm:$0xff] %v2800_v14  }
 0x481 PF: > { %s19_s30 = sadd.s32 1, %s3218_s30  }
 0x482   : > { %p16_p5 = scmp.ge.s32.totalorder %s19_s30, 4  }
 0x484   :  { %18 = sbr.rel (!%p16_p5) target bundleno = 1 (0x1), region = 92 }

</bundles_post_ra>
